<compile_context>
chip_gen: v7x
topology: tpu7x:2x2x1
jax: 0.10.0
libtpu: 0.0.40
codegen_flags: <defaults>
</compile_context>

<pallas_src>
import jax
import jax.numpy as jnp
from jax import lax
from jax.experimental import pallas as pl
from jax.experimental.pallas import tpu as pltpu

# ---------------- small deterministic config ----------------
HIDDEN = 64
NUM_HEADS = 2
HEAD_DIM = HIDDEN // NUM_HEADS          # 32
NUM_LAYERS = 2
INNER = 4 * HIDDEN                      # 256 (config.n_inner is None -> 4 * hidden)
VOCAB = 100
VOCAB_PAD = (VOCAB + 63) // 64 * 64     # 128, as in GPT2Model.__init__
MAX_POS = 32
SEQ = 8
LN_EPS = 1e-5
SCALE = HEAD_DIM ** -0.5

HEAD_PAD = 128                          # each head's q/k/v occupies a 128-lane slab
SLAB = NUM_HEADS * HEAD_PAD             # 256
VEC_ROWS = 16                           # coalesced per-layer vector tensor rows
# row layout of the coalesced per-layer vector tensor [L, VEC_ROWS, SLAB]
R_LN1_G, R_LN1_B, R_LN2_G, R_LN2_B = 0, 1, 2, 3
R_APROJ_B, R_MPROJ_B, R_FC_B = 4, 5, 6
R_Q_B, R_K_B, R_V_B = 8, 9, 10


# ---------------- in-kernel helpers (all f32 elementwise) ----------------
def _layernorm(x, g, b):
    mean = jnp.mean(x, axis=-1, keepdims=True)
    var = jnp.mean(jnp.square(x - mean), axis=-1, keepdims=True)
    return (x - mean) * lax.rsqrt(var + LN_EPS) * g + b


def _gelu_new(x):
    # GPT-2 "gelu_new" (tanh approximation), matches vLLM get_act_fn("gelu_new")
    return 0.5 * x * (1.0 + jnp.tanh(0.7978845608028654 * (x + 0.044715 * x * x * x)))


# ---------------- fused forward kernel (single invocation, no grid) ----------------
def gpt2_fused_kernel(h0_ref, vecs_ref, wq_ref, wk_ref, wv_ref,
                      aproj_ref, fcw_ref, mprojw_ref, lnf_ref, lm_ref,
                      logits_ref):
    h = h0_ref[...]                                         # [T, H] f32 residual stream
    T = h.shape[0]

    row = lax.broadcasted_iota(jnp.int32, (T, T), 0)
    col = lax.broadcasted_iota(jnp.int32, (T, T), 1)
    causal = col <= row
    NEG = jnp.float32(-1e30)

    # TODO(synk): vLLM PagedAttention KV-cache read/write (key_cache/value_cache,
    # slot mapping, InputMetadata, cache_events) has no clean equivalent here;
    # prefill-style causal attention over the in-flight sequence is computed.
    for l in range(NUM_LAYERS):          # static, fully unrolled -> straight-line code
        vecs = vecs_ref[l]               # [VEC_ROWS, SLAB] f32: all per-layer vectors
        ln1_g = vecs[R_LN1_G, :HIDDEN]
        ln1_b = vecs[R_LN1_B, :HIDDEN]
        ln2_g = vecs[R_LN2_G, :HIDDEN]
        ln2_b = vecs[R_LN2_B, :HIDDEN]
        aproj_b = vecs[R_APROJ_B, :HIDDEN]
        mproj_b = vecs[R_MPROJ_B, :HIDDEN]
        fc_b = vecs[R_FC_B, :INNER]
        q_b = vecs[R_Q_B]                # [SLAB], zero in pad lanes
        k_b = vecs[R_K_B]
        v_b = vecs[R_V_B]

        # ---- attention sub-block ----
        residual = h
        x = _layernorm(h, ln1_g, ln1_b)
        xb = x.astype(jnp.bfloat16)
        q = jnp.dot(xb, wq_ref[l], preferred_element_type=jnp.float32) + q_b   # [T, SLAB]
        k = jnp.dot(xb, wk_ref[l], preferred_element_type=jnp.float32) + k_b
        v = jnp.dot(xb, wv_ref[l], preferred_element_type=jnp.float32) + v_b

        acc = jnp.zeros((T, HIDDEN), jnp.float32)
        for hd in range(NUM_HEADS):                       # static, unrolled
            s0 = hd * HEAD_PAD                            # 128-lane-aligned slab start
            qh = q[:, s0:s0 + HEAD_PAD].astype(jnp.bfloat16)
            kh = k[:, s0:s0 + HEAD_PAD].astype(jnp.bfloat16)
            vh = v[:, s0:s0 + HEAD_PAD].astype(jnp.bfloat16)
            # scores: contract the (zero-padded) head dim of q against k
            s = lax.dot_general(qh, kh, (((1,), (1,)), ((), ())),
                                preferred_element_type=jnp.float32) * SCALE
            s = jnp.where(causal, s, NEG)
            m = jnp.max(s, axis=-1, keepdims=True)
            p = jnp.exp(s - m)
            p = p / jnp.sum(p, axis=-1, keepdims=True)    # exact normalization (f32)
            o = jnp.dot(p.astype(jnp.bfloat16), vh,
                        preferred_element_type=jnp.float32)        # [T, HEAD_PAD]
            # accumulate straight into the output projection via the head's
            # sublane-aligned [HEAD_PAD, H] slab of c_proj (no concat, no relayout)
            acc = acc + jnp.dot(o.astype(jnp.bfloat16),
                                aproj_ref[l, s0:s0 + HEAD_PAD, :],
                                preferred_element_type=jnp.float32)
        h = residual + acc + aproj_b

        # ---- MLP sub-block ----
        residual = h
        x = _layernorm(h, ln2_g, ln2_b)
        u = jnp.dot(x.astype(jnp.bfloat16), fcw_ref[l],
                    preferred_element_type=jnp.float32) + fc_b     # [T, INNER]
        u = _gelu_new(u)
        y = jnp.dot(u.astype(jnp.bfloat16), mprojw_ref[l],
                    preferred_element_type=jnp.float32) + mproj_b
        h = residual + y

    # ---- final layernorm + tied lm head (pre-transposed [H, VOCAB_PAD], bf16) ----
    lnf = lnf_ref[...]                                     # [2, H]: rows = gamma, beta
    hf = _layernorm(h, lnf[0], lnf[1])
    logits_ref[...] = jnp.dot(hf.astype(jnp.bfloat16), lm_ref[...],
                              preferred_element_type=jnp.float32)


# ---------------- parameters (deterministic, synthetic, kernel-friendly layout) ----------------
def init_params(key):
    def nrm(k, shape, scale=0.02):
        return scale * jax.random.normal(k, shape, dtype=jnp.float32)

    ks = jax.random.split(key, 14)
    L, H, I, D, NH = NUM_LAYERS, HIDDEN, INNER, HEAD_DIM, NUM_HEADS

    wte = nrm(ks[0], (VOCAB_PAD, H))
    wte = wte.at[VOCAB:].set(0.0)        # zero the padded vocab rows
    wpe = nrm(ks[1], (MAX_POS, H))

    def qkv_weight(k):
        # per-head columns zero-padded to a 128-lane slab -> [L, H, SLAB] bf16
        w = nrm(k, (L, H, NH, D))
        w = jnp.pad(w, ((0, 0), (0, 0), (0, 0), (0, HEAD_PAD - D)))
        return w.reshape(L, H, SLAB).astype(jnp.bfloat16)

    def qkv_bias(k):
        b = nrm(k, (L, NH, D))
        b = jnp.pad(b, ((0, 0), (0, 0), (0, HEAD_PAD - D)))
        return b.reshape(L, SLAB)        # f32 (lives in the coalesced vecs tensor)

    wq, wk, wv = qkv_weight(ks[2]), qkv_weight(ks[3]), qkv_weight(ks[4])
    qb, kb, vb = qkv_bias(ks[5]), qkv_bias(ks[6]), qkv_bias(ks[7])

    # attn c_proj: per-head rows zero-padded to a 128-row slab -> [L, SLAB, H] bf16
    aproj = nrm(ks[8], (L, NH, D, H))
    aproj = jnp.pad(aproj, ((0, 0), (0, 0), (0, HEAD_PAD - D), (0, 0)))
    aproj = aproj.reshape(L, SLAB, H).astype(jnp.bfloat16)
    aproj_b = nrm(ks[9], (L, H))

    fc_w = nrm(ks[10], (L, H, I)).astype(jnp.bfloat16)     # mlp c_fc
    fc_b = nrm(ks[11], (L, I))
    mproj_w = nrm(ks[12], (L, I, H)).astype(jnp.bfloat16)  # mlp c_proj
    mproj_b = nrm(ks[13], (L, H))

    # coalesced per-layer vector tensor: one DMA for all LN params / biases
    vecs = jnp.zeros((L, VEC_ROWS, SLAB), jnp.float32)
    vecs = vecs.at[:, R_LN1_G, :H].set(1.0)                # ln1 gamma
    vecs = vecs.at[:, R_LN2_G, :H].set(1.0)                # ln2 gamma
    vecs = vecs.at[:, R_APROJ_B, :H].set(aproj_b)
    vecs = vecs.at[:, R_MPROJ_B, :H].set(mproj_b)
    vecs = vecs.at[:, R_FC_B, :I].set(fc_b)
    vecs = vecs.at[:, R_Q_B, :].set(qb)
    vecs = vecs.at[:, R_K_B, :].set(kb)
    vecs = vecs.at[:, R_V_B, :].set(vb)
    # (ln1_b / ln2_b rows stay zero, matching nn.LayerNorm init)

    lnf = jnp.zeros((2, H), jnp.float32).at[0].set(1.0)    # rows: gamma, beta

    # tied lm head, pre-transposed to lane-dense [H, VOCAB_PAD] bf16
    lm_head = wte.T.astype(jnp.bfloat16)

    return {"wte": wte, "wpe": wpe, "vecs": vecs,
            "wq": wq, "wk": wk, "wv": wv, "aproj_w": aproj,
            "fc_w": fc_w, "mproj_w": mproj_w,
            "lnf": lnf, "lm_head": lm_head}


# ---------------- forward pass (GPT2LMHeadModel.forward semantics) ----------------
def gpt2_forward(params, input_ids, positions):
    # embeddings (wte + wpe) — gather glue in JAX
    h0 = params["wte"][input_ids] + params["wpe"][positions]        # [T, H] f32
    T = h0.shape[0]

    vmem_spec = pl.BlockSpec(memory_space=pltpu.MemorySpace.VMEM)   # whole array in VMEM

    # advisory cost estimate for XLA scheduling around the custom call
    flops = NUM_LAYERS * (3 * 2 * T * HIDDEN * SLAB
                          + NUM_HEADS * (4 * T * T * HEAD_PAD + 2 * T * HEAD_PAD * HIDDEN)
                          + 2 * T * HIDDEN * INNER + 2 * T * INNER * HIDDEN)
    flops += 2 * T * HIDDEN * VOCAB_PAD
    transcendentals = NUM_LAYERS * (NUM_HEADS * T * T + T * INNER) + (2 * NUM_LAYERS + 1) * T
    bytes_accessed = (4 * T * HIDDEN
                      + 4 * NUM_LAYERS * VEC_ROWS * SLAB
                      + 2 * NUM_LAYERS * (3 * HIDDEN * SLAB + SLAB * HIDDEN
                                          + HIDDEN * INNER + INNER * HIDDEN)
                      + 4 * 2 * HIDDEN + 2 * HIDDEN * VOCAB_PAD
                      + 4 * T * VOCAB_PAD)

    logits = pl.pallas_call(
        gpt2_fused_kernel,
        out_shape=jax.ShapeDtypeStruct((T, VOCAB_PAD), jnp.float32),
        in_specs=[vmem_spec] * 10,
        out_specs=vmem_spec,
        cost_estimate=pl.CostEstimate(flops=flops,
                                      transcendentals=transcendentals,
                                      bytes_accessed=bytes_accessed),
    )(h0, params["vecs"], params["wq"], params["wk"], params["wv"],
      params["aproj_w"], params["fc_w"], params["mproj_w"],
      params["lnf"], params["lm_head"])

    # Sampler (greedy): argmax over the real vocab at the last position.
    next_token = jnp.argmax(logits[-1, :VOCAB])
    return next_token, logits


if __name__ == "__main__":
    key = jax.random.PRNGKey(0)
    pkey, ikey = jax.random.split(key)
    params = init_params(pkey)

    input_ids = jax.random.randint(ikey, (SEQ,), 0, VOCAB, dtype=jnp.int32)
    positions = jnp.arange(SEQ, dtype=jnp.int32)

    next_token, logits = jax.jit(gpt2_forward)(params, input_ids, positions)
    jax.block_until_ready((next_token, logits))
    assert logits.shape == (SEQ, VOCAB_PAD)
    assert int(next_token) < VOCAB
    print("KERNEL_OK")
</pallas_src>

<mosaic_0001>
module attributes {stable_mosaic.version = 11 : i64} {
  func.func @gpt2_fused_kernel(%arg0: memref<8x64xf32, #tpu.memory_space<vmem>>, %arg1: memref<2x16x256xf32, #tpu.memory_space<vmem>>, %arg2: memref<2x64x256xbf16, #tpu.memory_space<vmem>>, %arg3: memref<2x64x256xbf16, #tpu.memory_space<vmem>>, %arg4: memref<2x64x256xbf16, #tpu.memory_space<vmem>>, %arg5: memref<2x256x64xbf16, #tpu.memory_space<vmem>>, %arg6: memref<2x64x256xbf16, #tpu.memory_space<vmem>>, %arg7: memref<2x256x64xbf16, #tpu.memory_space<vmem>>, %arg8: memref<2x64xf32, #tpu.memory_space<vmem>>, %arg9: memref<64x128xbf16, #tpu.memory_space<vmem>>, %arg10: memref<8x128xf32, #tpu.memory_space<vmem>>) attributes {dimension_semantics = [], scalar_prefetch = 0 : i64, scratch_operands = 0 : i64, tpu.core_type = #tpu.core_type<tc>} {
    %c0 = arith.constant 0 : index
    %c0_0 = arith.constant 0 : index
    %0 = vector.load %arg0[%c0, %c0_0] : memref<8x64xf32, #tpu.memory_space<vmem>>, vector<8x64xf32>
    %1 = tpu.iota {dimensions = array<i32: 0>} : vector<8x8xi32>
    %2 = tpu.iota {dimensions = array<i32: 1>} : vector<8x8xi32>
    %3 = arith.cmpi sle, %2, %1 : vector<8x8xi32>
    %c0_1 = arith.constant 0 : index
    %c0_2 = arith.constant 0 : index
    %c0_3 = arith.constant 0 : index
    %4 = vector.load %arg1[%c0_1, %c0_2, %c0_3] : memref<2x16x256xf32, #tpu.memory_space<vmem>>, vector<1x16x256xf32>
    %5 = vector.shape_cast %4 : vector<1x16x256xf32> to vector<16x256xf32>
    %6 = vector.extract_strided_slice %5 {offsets = [0, 0], sizes = [1, 64], strides = [1, 1]} : vector<16x256xf32> to vector<1x64xf32>
    %7 = vector.shape_cast %6 : vector<1x64xf32> to vector<64xf32>
    %8 = vector.extract_strided_slice %5 {offsets = [1, 0], sizes = [1, 64], strides = [1, 1]} : vector<16x256xf32> to vector<1x64xf32>
    %9 = vector.shape_cast %8 : vector<1x64xf32> to vector<64xf32>
    %10 = vector.extract_strided_slice %5 {offsets = [2, 0], sizes = [1, 64], strides = [1, 1]} : vector<16x256xf32> to vector<1x64xf32>
    %11 = vector.shape_cast %10 : vector<1x64xf32> to vector<64xf32>
    %12 = vector.extract_strided_slice %5 {offsets = [3, 0], sizes = [1, 64], strides = [1, 1]} : vector<16x256xf32> to vector<1x64xf32>
    %13 = vector.shape_cast %12 : vector<1x64xf32> to vector<64xf32>
    %14 = vector.extract_strided_slice %5 {offsets = [4, 0], sizes = [1, 64], strides = [1, 1]} : vector<16x256xf32> to vector<1x64xf32>
    %15 = vector.shape_cast %14 : vector<1x64xf32> to vector<64xf32>
    %16 = vector.extract_strided_slice %5 {offsets = [5, 0], sizes = [1, 64], strides = [1, 1]} : vector<16x256xf32> to vector<1x64xf32>
    %17 = vector.shape_cast %16 : vector<1x64xf32> to vector<64xf32>
    %18 = vector.extract_strided_slice %5 {offsets = [6, 0], sizes = [1, 256], strides = [1, 1]} : vector<16x256xf32> to vector<1x256xf32>
    %19 = vector.shape_cast %18 : vector<1x256xf32> to vector<256xf32>
    %20 = vector.extract_strided_slice %5 {offsets = [8, 0], sizes = [1, 256], strides = [1, 1]} : vector<16x256xf32> to vector<1x256xf32>
    %21 = vector.shape_cast %20 : vector<1x256xf32> to vector<256xf32>
    %22 = vector.extract_strided_slice %5 {offsets = [9, 0], sizes = [1, 256], strides = [1, 1]} : vector<16x256xf32> to vector<1x256xf32>
    %23 = vector.shape_cast %22 : vector<1x256xf32> to vector<256xf32>
    %24 = vector.extract_strided_slice %5 {offsets = [10, 0], sizes = [1, 256], strides = [1, 1]} : vector<16x256xf32> to vector<1x256xf32>
    %25 = vector.shape_cast %24 : vector<1x256xf32> to vector<256xf32>
    %cst = arith.constant dense<0.000000e+00> : vector<8xf32>
    %26 = vector.multi_reduction <add>, %0, %cst [1] : vector<8x64xf32> to vector<8xf32>
    %27 = vector.shape_cast %26 : vector<8xf32> to vector<8x1xf32>
    %cst_4 = arith.constant 6.400000e+01 : f32
    %28 = vector.broadcast %cst_4 : f32 to vector<8x1xf32>
    %29 = arith.divf %27, %28 : vector<8x1xf32>
    %30 = vector.broadcast %29 : vector<8x1xf32> to vector<8x64xf32>
    %31 = arith.subf %0, %30 : vector<8x64xf32>
    %32 = arith.mulf %31, %31 : vector<8x64xf32>
    %cst_5 = arith.constant dense<0.000000e+00> : vector<8xf32>
    %33 = vector.multi_reduction <add>, %32, %cst_5 [1] : vector<8x64xf32> to vector<8xf32>
    %34 = vector.shape_cast %33 : vector<8xf32> to vector<8x1xf32>
    %cst_6 = arith.constant 6.400000e+01 : f32
    %35 = vector.broadcast %cst_6 : f32 to vector<8x1xf32>
    %36 = arith.divf %34, %35 : vector<8x1xf32>
    %37 = vector.broadcast %29 : vector<8x1xf32> to vector<8x64xf32>
    %38 = arith.subf %0, %37 : vector<8x64xf32>
    %cst_7 = arith.constant 9.99999974E-6 : f32
    %39 = vector.broadcast %cst_7 : f32 to vector<8x1xf32>
    %40 = arith.addf %36, %39 : vector<8x1xf32>
    %41 = math.rsqrt %40 : vector<8x1xf32>
    %42 = vector.broadcast %41 : vector<8x1xf32> to vector<8x64xf32>
    %43 = arith.mulf %38, %42 : vector<8x64xf32>
    %44 = vector.shape_cast %7 : vector<64xf32> to vector<1x64xf32>
    %45 = vector.broadcast %44 : vector<1x64xf32> to vector<8x64xf32>
    %46 = arith.mulf %43, %45 : vector<8x64xf32>
    %47 = vector.shape_cast %9 : vector<64xf32> to vector<1x64xf32>
    %48 = vector.broadcast %47 : vector<1x64xf32> to vector<8x64xf32>
    %49 = arith.addf %46, %48 : vector<8x64xf32>
    %50 = arith.truncf %49 : vector<8x64xf32> to vector<8x64xbf16>
    %c0_8 = arith.constant 0 : index
    %c0_9 = arith.constant 0 : index
    %c0_10 = arith.constant 0 : index
    %51 = vector.load %arg2[%c0_8, %c0_9, %c0_10] : memref<2x64x256xbf16, #tpu.memory_space<vmem>>, vector<1x64x256xbf16>
    %52 = vector.shape_cast %51 : vector<1x64x256xbf16> to vector<64x256xbf16>
    %cst_11 = arith.constant dense<0.000000e+00> : vector<8x256xf32>
    %53 = tpu.matmul %50, %52, %cst_11 {dimension_numbers = #tpu.dot_dimension_numbers<[1], [0], [0], [1], [0, 0, 1, 1], [], []>} : vector<8x64xbf16>, vector<64x256xbf16>, vector<8x256xf32> -> vector<8x256xf32>
    %54 = vector.shape_cast %21 : vector<256xf32> to vector<1x256xf32>
    %55 = vector.broadcast %54 : vector<1x256xf32> to vector<8x256xf32>
    %56 = arith.addf %53, %55 : vector<8x256xf32>
    %c0_12 = arith.constant 0 : index
    %c0_13 = arith.constant 0 : index
    %c0_14 = arith.constant 0 : index
    %57 = vector.load %arg3[%c0_12, %c0_13, %c0_14] : memref<2x64x256xbf16, #tpu.memory_space<vmem>>, vector<1x64x256xbf16>
    %58 = vector.shape_cast %57 : vector<1x64x256xbf16> to vector<64x256xbf16>
    %cst_15 = arith.constant dense<0.000000e+00> : vector<8x256xf32>
    %59 = tpu.matmul %50, %58, %cst_15 {dimension_numbers = #tpu.dot_dimension_numbers<[1], [0], [0], [1], [0, 0, 1, 1], [], []>} : vector<8x64xbf16>, vector<64x256xbf16>, vector<8x256xf32> -> vector<8x256xf32>
    %60 = vector.shape_cast %23 : vector<256xf32> to vector<1x256xf32>
    %61 = vector.broadcast %60 : vector<1x256xf32> to vector<8x256xf32>
    %62 = arith.addf %59, %61 : vector<8x256xf32>
    %c0_16 = arith.constant 0 : index
    %c0_17 = arith.constant 0 : index
    %c0_18 = arith.constant 0 : index
    %63 = vector.load %arg4[%c0_16, %c0_17, %c0_18] : memref<2x64x256xbf16, #tpu.memory_space<vmem>>, vector<1x64x256xbf16>
    %64 = vector.shape_cast %63 : vector<1x64x256xbf16> to vector<64x256xbf16>
    %cst_19 = arith.constant dense<0.000000e+00> : vector<8x256xf32>
    %65 = tpu.matmul %50, %64, %cst_19 {dimension_numbers = #tpu.dot_dimension_numbers<[1], [0], [0], [1], [0, 0, 1, 1], [], []>} : vector<8x64xbf16>, vector<64x256xbf16>, vector<8x256xf32> -> vector<8x256xf32>
    %66 = vector.shape_cast %25 : vector<256xf32> to vector<1x256xf32>
    %67 = vector.broadcast %66 : vector<1x256xf32> to vector<8x256xf32>
    %68 = arith.addf %65, %67 : vector<8x256xf32>
    %cst_20 = arith.constant 0.000000e+00 : f32
    %69 = vector.broadcast %cst_20 : f32 to vector<8x64xf32>
    %70 = vector.extract_strided_slice %56 {offsets = [0, 0], sizes = [8, 128], strides = [1, 1]} : vector<8x256xf32> to vector<8x128xf32>
    %71 = arith.truncf %70 : vector<8x128xf32> to vector<8x128xbf16>
    %72 = vector.extract_strided_slice %62 {offsets = [0, 0], sizes = [8, 128], strides = [1, 1]} : vector<8x256xf32> to vector<8x128xf32>
    %73 = arith.truncf %72 : vector<8x128xf32> to vector<8x128xbf16>
    %74 = vector.extract_strided_slice %68 {offsets = [0, 0], sizes = [8, 128], strides = [1, 1]} : vector<8x256xf32> to vector<8x128xf32>
    %75 = arith.truncf %74 : vector<8x128xf32> to vector<8x128xbf16>
    %cst_21 = arith.constant dense<0.000000e+00> : vector<8x8xf32>
    %76 = tpu.matmul %71, %73, %cst_21 {dimension_numbers = #tpu.dot_dimension_numbers<[1], [1], [0], [0], [0, 0, 1, 0], [], []>} : vector<8x128xbf16>, vector<8x128xbf16>, vector<8x8xf32> -> vector<8x8xf32>
    %cst_22 = arith.constant 0.176776692 : f32
    %77 = vector.broadcast %cst_22 : f32 to vector<8x8xf32>
    %78 = arith.mulf %76, %77 : vector<8x8xf32>
    %cst_23 = arith.constant -1.000000e+30 : f32
    %79 = vector.broadcast %cst_23 : f32 to vector<8x8xf32>
    %80 = arith.select %3, %78, %79 : vector<8x8xi1>, vector<8x8xf32>
    %cst_24 = arith.constant dense<0xFF800000> : vector<8xf32>
    %81 = vector.multi_reduction <maximumf>, %80, %cst_24 [1] : vector<8x8xf32> to vector<8xf32>
    %82 = vector.shape_cast %81 : vector<8xf32> to vector<8x1xf32>
    %83 = vector.broadcast %82 : vector<8x1xf32> to vector<8x8xf32>
    %84 = arith.subf %80, %83 : vector<8x8xf32>
    %85 = math.exp %84 : vector<8x8xf32>
    %cst_25 = arith.constant dense<0.000000e+00> : vector<8xf32>
    %86 = vector.multi_reduction <add>, %85, %cst_25 [1] : vector<8x8xf32> to vector<8xf32>
    %87 = vector.shape_cast %86 : vector<8xf32> to vector<8x1xf32>
    %88 = vector.broadcast %87 : vector<8x1xf32> to vector<8x8xf32>
    %89 = arith.divf %85, %88 : vector<8x8xf32>
    %90 = arith.truncf %89 : vector<8x8xf32> to vector<8x8xbf16>
    %cst_26 = arith.constant dense<0.000000e+00> : vector<8x128xf32>
    %91 = tpu.matmul %90, %75, %cst_26 {dimension_numbers = #tpu.dot_dimension_numbers<[1], [0], [0], [1], [0, 0, 1, 1], [], []>} : vector<8x8xbf16>, vector<8x128xbf16>, vector<8x128xf32> -> vector<8x128xf32>
    %92 = arith.truncf %91 : vector<8x128xf32> to vector<8x128xbf16>
    %c0_27 = arith.constant 0 : index
    %c0_28 = arith.constant 0 : index
    %c0_29 = arith.constant 0 : index
    %93 = vector.load %arg5[%c0_27, %c0_28, %c0_29] : memref<2x256x64xbf16, #tpu.memory_space<vmem>>, vector<1x128x64xbf16>
    %94 = vector.shape_cast %93 : vector<1x128x64xbf16> to vector<128x64xbf16>
    %cst_30 = arith.constant dense<0.000000e+00> : vector<8x64xf32>
    %95 = tpu.matmul %92, %94, %cst_30 {dimension_numbers = #tpu.dot_dimension_numbers<[1], [0], [0], [1], [0, 0, 1, 1], [], []>} : vector<8x128xbf16>, vector<128x64xbf16>, vector<8x64xf32> -> vector<8x64xf32>
    %96 = arith.addf %69, %95 : vector<8x64xf32>
    %97 = vector.extract_strided_slice %56 {offsets = [0, 128], sizes = [8, 128], strides = [1, 1]} : vector<8x256xf32> to vector<8x128xf32>
    %98 = arith.truncf %97 : vector<8x128xf32> to vector<8x128xbf16>
    %99 = vector.extract_strided_slice %62 {offsets = [0, 128], sizes = [8, 128], strides = [1, 1]} : vector<8x256xf32> to vector<8x128xf32>
    %100 = arith.truncf %99 : vector<8x128xf32> to vector<8x128xbf16>
    %101 = vector.extract_strided_slice %68 {offsets = [0, 128], sizes = [8, 128], strides = [1, 1]} : vector<8x256xf32> to vector<8x128xf32>
    %102 = arith.truncf %101 : vector<8x128xf32> to vector<8x128xbf16>
    %cst_31 = arith.constant dense<0.000000e+00> : vector<8x8xf32>
    %103 = tpu.matmul %98, %100, %cst_31 {dimension_numbers = #tpu.dot_dimension_numbers<[1], [1], [0], [0], [0, 0, 1, 0], [], []>} : vector<8x128xbf16>, vector<8x128xbf16>, vector<8x8xf32> -> vector<8x8xf32>
    %cst_32 = arith.constant 0.176776692 : f32
    %104 = vector.broadcast %cst_32 : f32 to vector<8x8xf32>
    %105 = arith.mulf %103, %104 : vector<8x8xf32>
    %cst_33 = arith.constant -1.000000e+30 : f32
    %106 = vector.broadcast %cst_33 : f32 to vector<8x8xf32>
    %107 = arith.select %3, %105, %106 : vector<8x8xi1>, vector<8x8xf32>
    %cst_34 = arith.constant dense<0xFF800000> : vector<8xf32>
    %108 = vector.multi_reduction <maximumf>, %107, %cst_34 [1] : vector<8x8xf32> to vector<8xf32>
    %109 = vector.shape_cast %108 : vector<8xf32> to vector<8x1xf32>
    %110 = vector.broadcast %109 : vector<8x1xf32> to vector<8x8xf32>
    %111 = arith.subf %107, %110 : vector<8x8xf32>
    %112 = math.exp %111 : vector<8x8xf32>
    %cst_35 = arith.constant dense<0.000000e+00> : vector<8xf32>
    %113 = vector.multi_reduction <add>, %112, %cst_35 [1] : vector<8x8xf32> to vector<8xf32>
    %114 = vector.shape_cast %113 : vector<8xf32> to vector<8x1xf32>
    %115 = vector.broadcast %114 : vector<8x1xf32> to vector<8x8xf32>
    %116 = arith.divf %112, %115 : vector<8x8xf32>
    %117 = arith.truncf %116 : vector<8x8xf32> to vector<8x8xbf16>
    %cst_36 = arith.constant dense<0.000000e+00> : vector<8x128xf32>
    %118 = tpu.matmul %117, %102, %cst_36 {dimension_numbers = #tpu.dot_dimension_numbers<[1], [0], [0], [1], [0, 0, 1, 1], [], []>} : vector<8x8xbf16>, vector<8x128xbf16>, vector<8x128xf32> -> vector<8x128xf32>
    %119 = arith.truncf %118 : vector<8x128xf32> to vector<8x128xbf16>
    %c0_37 = arith.constant 0 : index
    %c128 = arith.constant 128 : index
    %c0_38 = arith.constant 0 : index
    %120 = vector.load %arg5[%c0_37, %c128, %c0_38] : memref<2x256x64xbf16, #tpu.memory_space<vmem>>, vector<1x128x64xbf16>
    %121 = vector.shape_cast %120 : vector<1x128x64xbf16> to vector<128x64xbf16>
    %cst_39 = arith.constant dense<0.000000e+00> : vector<8x64xf32>
    %122 = tpu.matmul %119, %121, %cst_39 {dimension_numbers = #tpu.dot_dimension_numbers<[1], [0], [0], [1], [0, 0, 1, 1], [], []>} : vector<8x128xbf16>, vector<128x64xbf16>, vector<8x64xf32> -> vector<8x64xf32>
    %123 = arith.addf %96, %122 : vector<8x64xf32>
    %124 = arith.addf %0, %123 : vector<8x64xf32>
    %125 = vector.shape_cast %15 : vector<64xf32> to vector<1x64xf32>
    %126 = vector.broadcast %125 : vector<1x64xf32> to vector<8x64xf32>
    %127 = arith.addf %124, %126 : vector<8x64xf32>
    %cst_40 = arith.constant dense<0.000000e+00> : vector<8xf32>
    %128 = vector.multi_reduction <add>, %127, %cst_40 [1] : vector<8x64xf32> to vector<8xf32>
    %129 = vector.shape_cast %128 : vector<8xf32> to vector<8x1xf32>
    %cst_41 = arith.constant 6.400000e+01 : f32
    %130 = vector.broadcast %cst_41 : f32 to vector<8x1xf32>
    %131 = arith.divf %129, %130 : vector<8x1xf32>
    %132 = vector.broadcast %131 : vector<8x1xf32> to vector<8x64xf32>
    %133 = arith.subf %127, %132 : vector<8x64xf32>
    %134 = arith.mulf %133, %133 : vector<8x64xf32>
    %cst_42 = arith.constant dense<0.000000e+00> : vector<8xf32>
    %135 = vector.multi_reduction <add>, %134, %cst_42 [1] : vector<8x64xf32> to vector<8xf32>
    %136 = vector.shape_cast %135 : vector<8xf32> to vector<8x1xf32>
    %cst_43 = arith.constant 6.400000e+01 : f32
    %137 = vector.broadcast %cst_43 : f32 to vector<8x1xf32>
    %138 = arith.divf %136, %137 : vector<8x1xf32>
    %139 = vector.broadcast %131 : vector<8x1xf32> to vector<8x64xf32>
    %140 = arith.subf %127, %139 : vector<8x64xf32>
    %cst_44 = arith.constant 9.99999974E-6 : f32
    %141 = vector.broadcast %cst_44 : f32 to vector<8x1xf32>
    %142 = arith.addf %138, %141 : vector<8x1xf32>
    %143 = math.rsqrt %142 : vector<8x1xf32>
    %144 = vector.broadcast %143 : vector<8x1xf32> to vector<8x64xf32>
    %145 = arith.mulf %140, %144 : vector<8x64xf32>
    %146 = vector.shape_cast %11 : vector<64xf32> to vector<1x64xf32>
    %147 = vector.broadcast %146 : vector<1x64xf32> to vector<8x64xf32>
    %148 = arith.mulf %145, %147 : vector<8x64xf32>
    %149 = vector.shape_cast %13 : vector<64xf32> to vector<1x64xf32>
    %150 = vector.broadcast %149 : vector<1x64xf32> to vector<8x64xf32>
    %151 = arith.addf %148, %150 : vector<8x64xf32>
    %152 = arith.truncf %151 : vector<8x64xf32> to vector<8x64xbf16>
    %c0_45 = arith.constant 0 : index
    %c0_46 = arith.constant 0 : index
    %c0_47 = arith.constant 0 : index
    %153 = vector.load %arg6[%c0_45, %c0_46, %c0_47] : memref<2x64x256xbf16, #tpu.memory_space<vmem>>, vector<1x64x256xbf16>
    %154 = vector.shape_cast %153 : vector<1x64x256xbf16> to vector<64x256xbf16>
    %cst_48 = arith.constant dense<0.000000e+00> : vector<8x256xf32>
    %155 = tpu.matmul %152, %154, %cst_48 {dimension_numbers = #tpu.dot_dimension_numbers<[1], [0], [0], [1], [0, 0, 1, 1], [], []>} : vector<8x64xbf16>, vector<64x256xbf16>, vector<8x256xf32> -> vector<8x256xf32>
    %156 = vector.shape_cast %19 : vector<256xf32> to vector<1x256xf32>
    %157 = vector.broadcast %156 : vector<1x256xf32> to vector<8x256xf32>
    %158 = arith.addf %155, %157 : vector<8x256xf32>
    %cst_49 = arith.constant 5.000000e-01 : f32
    %159 = vector.broadcast %cst_49 : f32 to vector<8x256xf32>
    %160 = arith.mulf %159, %158 : vector<8x256xf32>
    %cst_50 = arith.constant 4.471500e-02 : f32
    %161 = vector.broadcast %cst_50 : f32 to vector<8x256xf32>
    %162 = arith.mulf %161, %158 : vector<8x256xf32>
    %163 = arith.mulf %162, %158 : vector<8x256xf32>
    %164 = arith.mulf %163, %158 : vector<8x256xf32>
    %165 = arith.addf %158, %164 : vector<8x256xf32>
    %cst_51 = arith.constant 0.797884583 : f32
    %166 = vector.broadcast %cst_51 : f32 to vector<8x256xf32>
    %167 = arith.mulf %166, %165 : vector<8x256xf32>
    %168 = math.tanh %167 : vector<8x256xf32>
    %cst_52 = arith.constant 1.000000e+00 : f32
    %169 = vector.broadcast %cst_52 : f32 to vector<8x256xf32>
    %170 = arith.addf %169, %168 : vector<8x256xf32>
    %171 = arith.mulf %160, %170 : vector<8x256xf32>
    %172 = arith.truncf %171 : vector<8x256xf32> to vector<8x256xbf16>
    %c0_53 = arith.constant 0 : index
    %c0_54 = arith.constant 0 : index
    %c0_55 = arith.constant 0 : index
    %173 = vector.load %arg7[%c0_53, %c0_54, %c0_55] : memref<2x256x64xbf16, #tpu.memory_space<vmem>>, vector<1x256x64xbf16>
    %174 = vector.shape_cast %173 : vector<1x256x64xbf16> to vector<256x64xbf16>
    %cst_56 = arith.constant dense<0.000000e+00> : vector<8x64xf32>
    %175 = tpu.matmul %172, %174, %cst_56 {dimension_numbers = #tpu.dot_dimension_numbers<[1], [0], [0], [1], [0, 0, 1, 1], [], []>} : vector<8x256xbf16>, vector<256x64xbf16>, vector<8x64xf32> -> vector<8x64xf32>
    %176 = vector.shape_cast %17 : vector<64xf32> to vector<1x64xf32>
    %177 = vector.broadcast %176 : vector<1x64xf32> to vector<8x64xf32>
    %178 = arith.addf %175, %177 : vector<8x64xf32>
    %179 = arith.addf %127, %178 : vector<8x64xf32>
    %c1 = arith.constant 1 : index
    %c0_57 = arith.constant 0 : index
    %c0_58 = arith.constant 0 : index
    %180 = vector.load %arg1[%c1, %c0_57, %c0_58] : memref<2x16x256xf32, #tpu.memory_space<vmem>>, vector<1x16x256xf32>
    %181 = vector.shape_cast %180 : vector<1x16x256xf32> to vector<16x256xf32>
    %182 = vector.extract_strided_slice %181 {offsets = [0, 0], sizes = [1, 64], strides = [1, 1]} : vector<16x256xf32> to vector<1x64xf32>
    %183 = vector.shape_cast %182 : vector<1x64xf32> to vector<64xf32>
    %184 = vector.extract_strided_slice %181 {offsets = [1, 0], sizes = [1, 64], strides = [1, 1]} : vector<16x256xf32> to vector<1x64xf32>
    %185 = vector.shape_cast %184 : vector<1x64xf32> to vector<64xf32>
    %186 = vector.extract_strided_slice %181 {offsets = [2, 0], sizes = [1, 64], strides = [1, 1]} : vector<16x256xf32> to vector<1x64xf32>
    %187 = vector.shape_cast %186 : vector<1x64xf32> to vector<64xf32>
    %188 = vector.extract_strided_slice %181 {offsets = [3, 0], sizes = [1, 64], strides = [1, 1]} : vector<16x256xf32> to vector<1x64xf32>
    %189 = vector.shape_cast %188 : vector<1x64xf32> to vector<64xf32>
    %190 = vector.extract_strided_slice %181 {offsets = [4, 0], sizes = [1, 64], strides = [1, 1]} : vector<16x256xf32> to vector<1x64xf32>
    %191 = vector.shape_cast %190 : vector<1x64xf32> to vector<64xf32>
    %192 = vector.extract_strided_slice %181 {offsets = [5, 0], sizes = [1, 64], strides = [1, 1]} : vector<16x256xf32> to vector<1x64xf32>
    %193 = vector.shape_cast %192 : vector<1x64xf32> to vector<64xf32>
    %194 = vector.extract_strided_slice %181 {offsets = [6, 0], sizes = [1, 256], strides = [1, 1]} : vector<16x256xf32> to vector<1x256xf32>
    %195 = vector.shape_cast %194 : vector<1x256xf32> to vector<256xf32>
    %196 = vector.extract_strided_slice %181 {offsets = [8, 0], sizes = [1, 256], strides = [1, 1]} : vector<16x256xf32> to vector<1x256xf32>
    %197 = vector.shape_cast %196 : vector<1x256xf32> to vector<256xf32>
    %198 = vector.extract_strided_slice %181 {offsets = [9, 0], sizes = [1, 256], strides = [1, 1]} : vector<16x256xf32> to vector<1x256xf32>
    %199 = vector.shape_cast %198 : vector<1x256xf32> to vector<256xf32>
    %200 = vector.extract_strided_slice %181 {offsets = [10, 0], sizes = [1, 256], strides = [1, 1]} : vector<16x256xf32> to vector<1x256xf32>
    %201 = vector.shape_cast %200 : vector<1x256xf32> to vector<256xf32>
    %cst_59 = arith.constant dense<0.000000e+00> : vector<8xf32>
    %202 = vector.multi_reduction <add>, %179, %cst_59 [1] : vector<8x64xf32> to vector<8xf32>
    %203 = vector.shape_cast %202 : vector<8xf32> to vector<8x1xf32>
    %cst_60 = arith.constant 6.400000e+01 : f32
    %204 = vector.broadcast %cst_60 : f32 to vector<8x1xf32>
    %205 = arith.divf %203, %204 : vector<8x1xf32>
    %206 = vector.broadcast %205 : vector<8x1xf32> to vector<8x64xf32>
    %207 = arith.subf %179, %206 : vector<8x64xf32>
    %208 = arith.mulf %207, %207 : vector<8x64xf32>
    %cst_61 = arith.constant dense<0.000000e+00> : vector<8xf32>
    %209 = vector.multi_reduction <add>, %208, %cst_61 [1] : vector<8x64xf32> to vector<8xf32>
    %210 = vector.shape_cast %209 : vector<8xf32> to vector<8x1xf32>
    %cst_62 = arith.constant 6.400000e+01 : f32
    %211 = vector.broadcast %cst_62 : f32 to vector<8x1xf32>
    %212 = arith.divf %210, %211 : vector<8x1xf32>
    %213 = vector.broadcast %205 : vector<8x1xf32> to vector<8x64xf32>
    %214 = arith.subf %179, %213 : vector<8x64xf32>
    %cst_63 = arith.constant 9.99999974E-6 : f32
    %215 = vector.broadcast %cst_63 : f32 to vector<8x1xf32>
    %216 = arith.addf %212, %215 : vector<8x1xf32>
    %217 = math.rsqrt %216 : vector<8x1xf32>
    %218 = vector.broadcast %217 : vector<8x1xf32> to vector<8x64xf32>
    %219 = arith.mulf %214, %218 : vector<8x64xf32>
    %220 = vector.shape_cast %183 : vector<64xf32> to vector<1x64xf32>
    %221 = vector.broadcast %220 : vector<1x64xf32> to vector<8x64xf32>
    %222 = arith.mulf %219, %221 : vector<8x64xf32>
    %223 = vector.shape_cast %185 : vector<64xf32> to vector<1x64xf32>
    %224 = vector.broadcast %223 : vector<1x64xf32> to vector<8x64xf32>
    %225 = arith.addf %222, %224 : vector<8x64xf32>
    %226 = arith.truncf %225 : vector<8x64xf32> to vector<8x64xbf16>
    %c1_64 = arith.constant 1 : index
    %c0_65 = arith.constant 0 : index
    %c0_66 = arith.constant 0 : index
    %227 = vector.load %arg2[%c1_64, %c0_65, %c0_66] : memref<2x64x256xbf16, #tpu.memory_space<vmem>>, vector<1x64x256xbf16>
    %228 = vector.shape_cast %227 : vector<1x64x256xbf16> to vector<64x256xbf16>
    %cst_67 = arith.constant dense<0.000000e+00> : vector<8x256xf32>
    %229 = tpu.matmul %226, %228, %cst_67 {dimension_numbers = #tpu.dot_dimension_numbers<[1], [0], [0], [1], [0, 0, 1, 1], [], []>} : vector<8x64xbf16>, vector<64x256xbf16>, vector<8x256xf32> -> vector<8x256xf32>
    %230 = vector.shape_cast %197 : vector<256xf32> to vector<1x256xf32>
    %231 = vector.broadcast %230 : vector<1x256xf32> to vector<8x256xf32>
    %232 = arith.addf %229, %231 : vector<8x256xf32>
    %c1_68 = arith.constant 1 : index
    %c0_69 = arith.constant 0 : index
    %c0_70 = arith.constant 0 : index
    %233 = vector.load %arg3[%c1_68, %c0_69, %c0_70] : memref<2x64x256xbf16, #tpu.memory_space<vmem>>, vector<1x64x256xbf16>
    %234 = vector.shape_cast %233 : vector<1x64x256xbf16> to vector<64x256xbf16>
    %cst_71 = arith.constant dense<0.000000e+00> : vector<8x256xf32>
    %235 = tpu.matmul %226, %234, %cst_71 {dimension_numbers = #tpu.dot_dimension_numbers<[1], [0], [0], [1], [0, 0, 1, 1], [], []>} : vector<8x64xbf16>, vector<64x256xbf16>, vector<8x256xf32> -> vector<8x256xf32>
    %236 = vector.shape_cast %199 : vector<256xf32> to vector<1x256xf32>
    %237 = vector.broadcast %236 : vector<1x256xf32> to vector<8x256xf32>
    %238 = arith.addf %235, %237 : vector<8x256xf32>
    %c1_72 = arith.constant 1 : index
    %c0_73 = arith.constant 0 : index
    %c0_74 = arith.constant 0 : index
    %239 = vector.load %arg4[%c1_72, %c0_73, %c0_74] : memref<2x64x256xbf16, #tpu.memory_space<vmem>>, vector<1x64x256xbf16>
    %240 = vector.shape_cast %239 : vector<1x64x256xbf16> to vector<64x256xbf16>
    %cst_75 = arith.constant dense<0.000000e+00> : vector<8x256xf32>
    %241 = tpu.matmul %226, %240, %cst_75 {dimension_numbers = #tpu.dot_dimension_numbers<[1], [0], [0], [1], [0, 0, 1, 1], [], []>} : vector<8x64xbf16>, vector<64x256xbf16>, vector<8x256xf32> -> vector<8x256xf32>
    %242 = vector.shape_cast %201 : vector<256xf32> to vector<1x256xf32>
    %243 = vector.broadcast %242 : vector<1x256xf32> to vector<8x256xf32>
    %244 = arith.addf %241, %243 : vector<8x256xf32>
    %cst_76 = arith.constant 0.000000e+00 : f32
    %245 = vector.broadcast %cst_76 : f32 to vector<8x64xf32>
    %246 = vector.extract_strided_slice %232 {offsets = [0, 0], sizes = [8, 128], strides = [1, 1]} : vector<8x256xf32> to vector<8x128xf32>
    %247 = arith.truncf %246 : vector<8x128xf32> to vector<8x128xbf16>
    %248 = vector.extract_strided_slice %238 {offsets = [0, 0], sizes = [8, 128], strides = [1, 1]} : vector<8x256xf32> to vector<8x128xf32>
    %249 = arith.truncf %248 : vector<8x128xf32> to vector<8x128xbf16>
    %250 = vector.extract_strided_slice %244 {offsets = [0, 0], sizes = [8, 128], strides = [1, 1]} : vector<8x256xf32> to vector<8x128xf32>
    %251 = arith.truncf %250 : vector<8x128xf32> to vector<8x128xbf16>
    %cst_77 = arith.constant dense<0.000000e+00> : vector<8x8xf32>
    %252 = tpu.matmul %247, %249, %cst_77 {dimension_numbers = #tpu.dot_dimension_numbers<[1], [1], [0], [0], [0, 0, 1, 0], [], []>} : vector<8x128xbf16>, vector<8x128xbf16>, vector<8x8xf32> -> vector<8x8xf32>
    %cst_78 = arith.constant 0.176776692 : f32
    %253 = vector.broadcast %cst_78 : f32 to vector<8x8xf32>
    %254 = arith.mulf %252, %253 : vector<8x8xf32>
    %cst_79 = arith.constant -1.000000e+30 : f32
    %255 = vector.broadcast %cst_79 : f32 to vector<8x8xf32>
    %256 = arith.select %3, %254, %255 : vector<8x8xi1>, vector<8x8xf32>
    %cst_80 = arith.constant dense<0xFF800000> : vector<8xf32>
    %257 = vector.multi_reduction <maximumf>, %256, %cst_80 [1] : vector<8x8xf32> to vector<8xf32>
    %258 = vector.shape_cast %257 : vector<8xf32> to vector<8x1xf32>
    %259 = vector.broadcast %258 : vector<8x1xf32> to vector<8x8xf32>
    %260 = arith.subf %256, %259 : vector<8x8xf32>
    %261 = math.exp %260 : vector<8x8xf32>
    %cst_81 = arith.constant dense<0.000000e+00> : vector<8xf32>
    %262 = vector.multi_reduction <add>, %261, %cst_81 [1] : vector<8x8xf32> to vector<8xf32>
    %263 = vector.shape_cast %262 : vector<8xf32> to vector<8x1xf32>
    %264 = vector.broadcast %263 : vector<8x1xf32> to vector<8x8xf32>
    %265 = arith.divf %261, %264 : vector<8x8xf32>
    %266 = arith.truncf %265 : vector<8x8xf32> to vector<8x8xbf16>
    %cst_82 = arith.constant dense<0.000000e+00> : vector<8x128xf32>
    %267 = tpu.matmul %266, %251, %cst_82 {dimension_numbers = #tpu.dot_dimension_numbers<[1], [0], [0], [1], [0, 0, 1, 1], [], []>} : vector<8x8xbf16>, vector<8x128xbf16>, vector<8x128xf32> -> vector<8x128xf32>
    %268 = arith.truncf %267 : vector<8x128xf32> to vector<8x128xbf16>
    %c1_83 = arith.constant 1 : index
    %c0_84 = arith.constant 0 : index
    %c0_85 = arith.constant 0 : index
    %269 = vector.load %arg5[%c1_83, %c0_84, %c0_85] : memref<2x256x64xbf16, #tpu.memory_space<vmem>>, vector<1x128x64xbf16>
    %270 = vector.shape_cast %269 : vector<1x128x64xbf16> to vector<128x64xbf16>
    %cst_86 = arith.constant dense<0.000000e+00> : vector<8x64xf32>
    %271 = tpu.matmul %268, %270, %cst_86 {dimension_numbers = #tpu.dot_dimension_numbers<[1], [0], [0], [1], [0, 0, 1, 1], [], []>} : vector<8x128xbf16>, vector<128x64xbf16>, vector<8x64xf32> -> vector<8x64xf32>
    %272 = arith.addf %245, %271 : vector<8x64xf32>
    %273 = vector.extract_strided_slice %232 {offsets = [0, 128], sizes = [8, 128], strides = [1, 1]} : vector<8x256xf32> to vector<8x128xf32>
    %274 = arith.truncf %273 : vector<8x128xf32> to vector<8x128xbf16>
    %275 = vector.extract_strided_slice %238 {offsets = [0, 128], sizes = [8, 128], strides = [1, 1]} : vector<8x256xf32> to vector<8x128xf32>
    %276 = arith.truncf %275 : vector<8x128xf32> to vector<8x128xbf16>
    %277 = vector.extract_strided_slice %244 {offsets = [0, 128], sizes = [8, 128], strides = [1, 1]} : vector<8x256xf32> to vector<8x128xf32>
    %278 = arith.truncf %277 : vector<8x128xf32> to vector<8x128xbf16>
    %cst_87 = arith.constant dense<0.000000e+00> : vector<8x8xf32>
    %279 = tpu.matmul %274, %276, %cst_87 {dimension_numbers = #tpu.dot_dimension_numbers<[1], [1], [0], [0], [0, 0, 1, 0], [], []>} : vector<8x128xbf16>, vector<8x128xbf16>, vector<8x8xf32> -> vector<8x8xf32>
    %cst_88 = arith.constant 0.176776692 : f32
    %280 = vector.broadcast %cst_88 : f32 to vector<8x8xf32>
    %281 = arith.mulf %279, %280 : vector<8x8xf32>
    %cst_89 = arith.constant -1.000000e+30 : f32
    %282 = vector.broadcast %cst_89 : f32 to vector<8x8xf32>
    %283 = arith.select %3, %281, %282 : vector<8x8xi1>, vector<8x8xf32>
    %cst_90 = arith.constant dense<0xFF800000> : vector<8xf32>
    %284 = vector.multi_reduction <maximumf>, %283, %cst_90 [1] : vector<8x8xf32> to vector<8xf32>
    %285 = vector.shape_cast %284 : vector<8xf32> to vector<8x1xf32>
    %286 = vector.broadcast %285 : vector<8x1xf32> to vector<8x8xf32>
    %287 = arith.subf %283, %286 : vector<8x8xf32>
    %288 = math.exp %287 : vector<8x8xf32>
    %cst_91 = arith.constant dense<0.000000e+00> : vector<8xf32>
    %289 = vector.multi_reduction <add>, %288, %cst_91 [1] : vector<8x8xf32> to vector<8xf32>
    %290 = vector.shape_cast %289 : vector<8xf32> to vector<8x1xf32>
    %291 = vector.broadcast %290 : vector<8x1xf32> to vector<8x8xf32>
    %292 = arith.divf %288, %291 : vector<8x8xf32>
    %293 = arith.truncf %292 : vector<8x8xf32> to vector<8x8xbf16>
    %cst_92 = arith.constant dense<0.000000e+00> : vector<8x128xf32>
    %294 = tpu.matmul %293, %278, %cst_92 {dimension_numbers = #tpu.dot_dimension_numbers<[1], [0], [0], [1], [0, 0, 1, 1], [], []>} : vector<8x8xbf16>, vector<8x128xbf16>, vector<8x128xf32> -> vector<8x128xf32>
    %295 = arith.truncf %294 : vector<8x128xf32> to vector<8x128xbf16>
    %c1_93 = arith.constant 1 : index
    %c128_94 = arith.constant 128 : index
    %c0_95 = arith.constant 0 : index
    %296 = vector.load %arg5[%c1_93, %c128_94, %c0_95] : memref<2x256x64xbf16, #tpu.memory_space<vmem>>, vector<1x128x64xbf16>
    %297 = vector.shape_cast %296 : vector<1x128x64xbf16> to vector<128x64xbf16>
    %cst_96 = arith.constant dense<0.000000e+00> : vector<8x64xf32>
    %298 = tpu.matmul %295, %297, %cst_96 {dimension_numbers = #tpu.dot_dimension_numbers<[1], [0], [0], [1], [0, 0, 1, 1], [], []>} : vector<8x128xbf16>, vector<128x64xbf16>, vector<8x64xf32> -> vector<8x64xf32>
    %299 = arith.addf %272, %298 : vector<8x64xf32>
    %300 = arith.addf %179, %299 : vector<8x64xf32>
    %301 = vector.shape_cast %191 : vector<64xf32> to vector<1x64xf32>
    %302 = vector.broadcast %301 : vector<1x64xf32> to vector<8x64xf32>
    %303 = arith.addf %300, %302 : vector<8x64xf32>
    %cst_97 = arith.constant dense<0.000000e+00> : vector<8xf32>
    %304 = vector.multi_reduction <add>, %303, %cst_97 [1] : vector<8x64xf32> to vector<8xf32>
    %305 = vector.shape_cast %304 : vector<8xf32> to vector<8x1xf32>
    %cst_98 = arith.constant 6.400000e+01 : f32
    %306 = vector.broadcast %cst_98 : f32 to vector<8x1xf32>
    %307 = arith.divf %305, %306 : vector<8x1xf32>
    %308 = vector.broadcast %307 : vector<8x1xf32> to vector<8x64xf32>
    %309 = arith.subf %303, %308 : vector<8x64xf32>
    %310 = arith.mulf %309, %309 : vector<8x64xf32>
    %cst_99 = arith.constant dense<0.000000e+00> : vector<8xf32>
    %311 = vector.multi_reduction <add>, %310, %cst_99 [1] : vector<8x64xf32> to vector<8xf32>
    %312 = vector.shape_cast %311 : vector<8xf32> to vector<8x1xf32>
    %cst_100 = arith.constant 6.400000e+01 : f32
    %313 = vector.broadcast %cst_100 : f32 to vector<8x1xf32>
    %314 = arith.divf %312, %313 : vector<8x1xf32>
    %315 = vector.broadcast %307 : vector<8x1xf32> to vector<8x64xf32>
    %316 = arith.subf %303, %315 : vector<8x64xf32>
    %cst_101 = arith.constant 9.99999974E-6 : f32
    %317 = vector.broadcast %cst_101 : f32 to vector<8x1xf32>
    %318 = arith.addf %314, %317 : vector<8x1xf32>
    %319 = math.rsqrt %318 : vector<8x1xf32>
    %320 = vector.broadcast %319 : vector<8x1xf32> to vector<8x64xf32>
    %321 = arith.mulf %316, %320 : vector<8x64xf32>
    %322 = vector.shape_cast %187 : vector<64xf32> to vector<1x64xf32>
    %323 = vector.broadcast %322 : vector<1x64xf32> to vector<8x64xf32>
    %324 = arith.mulf %321, %323 : vector<8x64xf32>
    %325 = vector.shape_cast %189 : vector<64xf32> to vector<1x64xf32>
    %326 = vector.broadcast %325 : vector<1x64xf32> to vector<8x64xf32>
    %327 = arith.addf %324, %326 : vector<8x64xf32>
    %328 = arith.truncf %327 : vector<8x64xf32> to vector<8x64xbf16>
    %c1_102 = arith.constant 1 : index
    %c0_103 = arith.constant 0 : index
    %c0_104 = arith.constant 0 : index
    %329 = vector.load %arg6[%c1_102, %c0_103, %c0_104] : memref<2x64x256xbf16, #tpu.memory_space<vmem>>, vector<1x64x256xbf16>
    %330 = vector.shape_cast %329 : vector<1x64x256xbf16> to vector<64x256xbf16>
    %cst_105 = arith.constant dense<0.000000e+00> : vector<8x256xf32>
    %331 = tpu.matmul %328, %330, %cst_105 {dimension_numbers = #tpu.dot_dimension_numbers<[1], [0], [0], [1], [0, 0, 1, 1], [], []>} : vector<8x64xbf16>, vector<64x256xbf16>, vector<8x256xf32> -> vector<8x256xf32>
    %332 = vector.shape_cast %195 : vector<256xf32> to vector<1x256xf32>
    %333 = vector.broadcast %332 : vector<1x256xf32> to vector<8x256xf32>
    %334 = arith.addf %331, %333 : vector<8x256xf32>
    %cst_106 = arith.constant 5.000000e-01 : f32
    %335 = vector.broadcast %cst_106 : f32 to vector<8x256xf32>
    %336 = arith.mulf %335, %334 : vector<8x256xf32>
    %cst_107 = arith.constant 4.471500e-02 : f32
    %337 = vector.broadcast %cst_107 : f32 to vector<8x256xf32>
    %338 = arith.mulf %337, %334 : vector<8x256xf32>
    %339 = arith.mulf %338, %334 : vector<8x256xf32>
    %340 = arith.mulf %339, %334 : vector<8x256xf32>
    %341 = arith.addf %334, %340 : vector<8x256xf32>
    %cst_108 = arith.constant 0.797884583 : f32
    %342 = vector.broadcast %cst_108 : f32 to vector<8x256xf32>
    %343 = arith.mulf %342, %341 : vector<8x256xf32>
    %344 = math.tanh %343 : vector<8x256xf32>
    %cst_109 = arith.constant 1.000000e+00 : f32
    %345 = vector.broadcast %cst_109 : f32 to vector<8x256xf32>
    %346 = arith.addf %345, %344 : vector<8x256xf32>
    %347 = arith.mulf %336, %346 : vector<8x256xf32>
    %348 = arith.truncf %347 : vector<8x256xf32> to vector<8x256xbf16>
    %c1_110 = arith.constant 1 : index
    %c0_111 = arith.constant 0 : index
    %c0_112 = arith.constant 0 : index
    %349 = vector.load %arg7[%c1_110, %c0_111, %c0_112] : memref<2x256x64xbf16, #tpu.memory_space<vmem>>, vector<1x256x64xbf16>
    %350 = vector.shape_cast %349 : vector<1x256x64xbf16> to vector<256x64xbf16>
    %cst_113 = arith.constant dense<0.000000e+00> : vector<8x64xf32>
    %351 = tpu.matmul %348, %350, %cst_113 {dimension_numbers = #tpu.dot_dimension_numbers<[1], [0], [0], [1], [0, 0, 1, 1], [], []>} : vector<8x256xbf16>, vector<256x64xbf16>, vector<8x64xf32> -> vector<8x64xf32>
    %352 = vector.shape_cast %193 : vector<64xf32> to vector<1x64xf32>
    %353 = vector.broadcast %352 : vector<1x64xf32> to vector<8x64xf32>
    %354 = arith.addf %351, %353 : vector<8x64xf32>
    %355 = arith.addf %303, %354 : vector<8x64xf32>
    %c0_114 = arith.constant 0 : index
    %c0_115 = arith.constant 0 : index
    %356 = vector.load %arg8[%c0_114, %c0_115] : memref<2x64xf32, #tpu.memory_space<vmem>>, vector<2x64xf32>
    %357 = vector.extract_strided_slice %356 {offsets = [0, 0], sizes = [1, 64], strides = [1, 1]} : vector<2x64xf32> to vector<1x64xf32>
    %358 = vector.shape_cast %357 : vector<1x64xf32> to vector<64xf32>
    %359 = vector.extract_strided_slice %356 {offsets = [1, 0], sizes = [1, 64], strides = [1, 1]} : vector<2x64xf32> to vector<1x64xf32>
    %360 = vector.shape_cast %359 : vector<1x64xf32> to vector<64xf32>
    %cst_116 = arith.constant dense<0.000000e+00> : vector<8xf32>
    %361 = vector.multi_reduction <add>, %355, %cst_116 [1] : vector<8x64xf32> to vector<8xf32>
    %362 = vector.shape_cast %361 : vector<8xf32> to vector<8x1xf32>
    %cst_117 = arith.constant 6.400000e+01 : f32
    %363 = vector.broadcast %cst_117 : f32 to vector<8x1xf32>
    %364 = arith.divf %362, %363 : vector<8x1xf32>
    %365 = vector.broadcast %364 : vector<8x1xf32> to vector<8x64xf32>
    %366 = arith.subf %355, %365 : vector<8x64xf32>
    %367 = arith.mulf %366, %366 : vector<8x64xf32>
    %cst_118 = arith.constant dense<0.000000e+00> : vector<8xf32>
    %368 = vector.multi_reduction <add>, %367, %cst_118 [1] : vector<8x64xf32> to vector<8xf32>
    %369 = vector.shape_cast %368 : vector<8xf32> to vector<8x1xf32>
    %cst_119 = arith.constant 6.400000e+01 : f32
    %370 = vector.broadcast %cst_119 : f32 to vector<8x1xf32>
    %371 = arith.divf %369, %370 : vector<8x1xf32>
    %372 = vector.broadcast %364 : vector<8x1xf32> to vector<8x64xf32>
    %373 = arith.subf %355, %372 : vector<8x64xf32>
    %cst_120 = arith.constant 9.99999974E-6 : f32
    %374 = vector.broadcast %cst_120 : f32 to vector<8x1xf32>
    %375 = arith.addf %371, %374 : vector<8x1xf32>
    %376 = math.rsqrt %375 : vector<8x1xf32>
    %377 = vector.broadcast %376 : vector<8x1xf32> to vector<8x64xf32>
    %378 = arith.mulf %373, %377 : vector<8x64xf32>
    %379 = vector.shape_cast %358 : vector<64xf32> to vector<1x64xf32>
    %380 = vector.broadcast %379 : vector<1x64xf32> to vector<8x64xf32>
    %381 = arith.mulf %378, %380 : vector<8x64xf32>
    %382 = vector.shape_cast %360 : vector<64xf32> to vector<1x64xf32>
    %383 = vector.broadcast %382 : vector<1x64xf32> to vector<8x64xf32>
    %384 = arith.addf %381, %383 : vector<8x64xf32>
    %385 = arith.truncf %384 : vector<8x64xf32> to vector<8x64xbf16>
    %c0_121 = arith.constant 0 : index
    %c0_122 = arith.constant 0 : index
    %386 = vector.load %arg9[%c0_121, %c0_122] : memref<64x128xbf16, #tpu.memory_space<vmem>>, vector<64x128xbf16>
    %cst_123 = arith.constant dense<0.000000e+00> : vector<8x128xf32>
    %387 = tpu.matmul %385, %386, %cst_123 {dimension_numbers = #tpu.dot_dimension_numbers<[1], [0], [0], [1], [0, 0, 1, 1], [], []>} : vector<8x64xbf16>, vector<64x128xbf16>, vector<8x128xf32> -> vector<8x128xf32>
    %c0_124 = arith.constant 0 : index
    %c0_125 = arith.constant 0 : index
    %388 = vector.load %arg10[%c0_124, %c0_125] : memref<8x128xf32, #tpu.memory_space<vmem>>, vector<8x128xf32>
    tpu.vector_store %arg10[%c0_124, %c0_125], %387 {strides = array<i32>} : memref<8x128xf32, #tpu.memory_space<vmem>>, vector<8x128xf32>,
    return
  }
}

</mosaic_0001>

<bundles_post_ra>
// kernel: gpt2_forward.1
= control target key start
LH: loop header
LB: loop body
LE: loop exit
PB: predicated region body
PF: predicated region fallthrough
CT: control target
= control target key end

     0   :  { %vm46_vm0 = vcmask 523264   ;;  %v2967_v9 = vmov 0   ;;  %v37_v27 = vlaneseq  ;;  %v2968_v47 = vmov 0.0   ;;  %s3684_s0 = inlined_call_operand.vmem [shape: f32[8,64], index: 0, kind: input, shape index: {}]   ;;  %s3685_s2 = inlined_call_operand.vmem [shape: bf16[2,64,256], index: 2, kind: input, shape index: {}]   ;;  %s3686_s3 = inlined_call_operand.vmem [shape: bf16[2,64,256], index: 3, kind: input, shape index: {}]   ;;  %s3687_s4 = inlined_call_operand.vmem [shape: bf16[2,64,256], index: 4, kind: input, shape index: {}]   ;;  %s3688_s1 = inlined_call_operand.vmem [shape: f32[2,16,256], index: 1, kind: input, shape index: {}]   ;;  %s3689_s5 = inlined_call_operand.vmem [shape: bf16[2,256,64], index: 5, kind: input, shape index: {}]   ;;  %s3690_s6 = inlined_call_operand.vmem [shape: bf16[2,64,256], index: 6, kind: input, shape index: {}]   ;;  %s3691_s7 = inlined_call_operand.vmem [shape: bf16[2,256,64], index: 7, kind: input, shape index: {}]   ;;  %s3692_s9 = inlined_call_operand.vmem [shape: bf16[64,128], index: 9, kind: input, shape index: {}]   ;;  %s3693_s8 = inlined_call_operand.vmem [shape: f32[2,64], index: 8, kind: input, shape index: {}]   ;;  %s3694_s10 = inlined_call_operand.vmem [shape: f32[8,128], index: 10, kind: output, shape index: {}]  }
   0x1   :  { %v3028_v0 = vld [vmem:[%s3684_s0] sm:$0xff]  ;;  %163 = vmatprep.mubr.bf16.mxu0 %v2967_v9  ;;  %260 = vmatprep.mubr.bf16.mxu1 %v2967_v9  ;;  %v2775_v12 = vld [vmem:[%s3685_s2 + $0x14] ss:$8 sps:$4 sm:$0xff]   ;;  %v2777_v13 = vld [vmem:[%s3685_s2 + $0x10] ss:$8 sps:$4 sm:$0xff]   ;;  %vm2969_vm1 = vmmov 0  }
   0x2   :  { %v47_v1 = vsel %vm46_vm0, %v3028_v0, 0.0  ;;  %v2769_v7 = vld [vmem:[%s3685_s2 + $0x4] ss:$8 sps:$4 sm:$0xff]   ;;  %v2771_v8 = vld [vmem:[%s3685_s2] ss:$8 sps:$4 sm:$0xff]   ;;  %v3088_v29 = vshrl.u32 %v37_v27, 7 }
   0x3   :  { %48 = vadd.xlane.f32.xlu0 %v47_v1  ;;  %131 = vmatprep.subr.bf16.mxu0 %v2769_v7  ;;  %v2772_v10 = vld [vmem:[%s3686_s3 + $0x4] ss:$8 sps:$4 sm:$0xff]   ;;  %v2774_v11 = vld [vmem:[%s3686_s3] ss:$8 sps:$4 sm:$0xff]   ;;  %v2778_v14 = vld [vmem:[%s3686_s3 + $0x14] ss:$8 sps:$4 sm:$0xff]  }
   0x4   :  { %132 = vmatpush1.bf16.msra.mxu0 %v2771_v8  ;;  %228 = vmatprep.subr.bf16.mxu1 %v2772_v10  ;;  %v2780_v15 = vld [vmem:[%s3686_s3 + $0x10] ss:$8 sps:$4 sm:$0xff]   ;;  %v2781_v16 = vld [vmem:[%s3685_s2 + $0x24] ss:$8 sps:$4 sm:$0xff]   ;;  %v2783_v17 = vld [vmem:[%s3685_s2 + $0x20] ss:$8 sps:$4 sm:$0xff]  }
   0x5   :  { %229 = vmatpush1.bf16.msra.mxu1 %v2774_v11  ;;  %133 = vmatprep.subr.bf16.mxu0 %v2775_v12  ;;  %v2784_v18 = vld [vmem:[%s3686_s3 + $0x24] ss:$8 sps:$4 sm:$0xff]   ;;  %v2787_v19 = vld [vmem:[%s3685_s2 + $0x34] ss:$8 sps:$4 sm:$0xff]   ;;  %v2786_v20 = vld [vmem:[%s3686_s3 + $0x20] ss:$8 sps:$4 sm:$0xff]  }
   0x6   :  { %230 = vmatprep.subr.bf16.mxu1 %v2778_v14  ;;  %v2790_v21 = vld [vmem:[%s3686_s3 + $0x34] ss:$8 sps:$4 sm:$0xff]   ;;  %v2789_v22 = vld [vmem:[%s3685_s2 + $0x30] ss:$8 sps:$4 sm:$0xff]   ;;  %v2795_v24 = vld [vmem:[%s3687_s4 + $0x4] ss:$8 sps:$4 sm:$0xff]  }
   0x7   :  { %v2792_v23 = vld [vmem:[%s3686_s3 + $0x30] ss:$8 sps:$4 sm:$0xff]   ;;  %v3091_v30 = vsub.s32 0, %v3088_v29  ;;  %v3096_v31 = vld [vmem:[%s3688_s1] sm:$0xff]  ;;  %v3099_v32 = vsub.s32 1, %v3088_v29  ;;  %vm427_vm2 = vcmask 1043456  }
   0x8   :  { %134 = vmatpush1.bf16.msra.mxu0 %v2777_v13  ;;  %v2793_v39 = vld [vmem:[%s3687_s4] ss:$8 sps:$4 sm:$0xff]   ;;  %v2798_v41 = vld [vmem:[%s3687_s4 + $0x14] ss:$8 sps:$4 sm:$0xff]   ;;  %v2796_v42 = vld [vmem:[%s3687_s4 + $0x10] ss:$8 sps:$4 sm:$0xff]  }
   0x9   :  { %135 = vmatprep.subr.bf16.mxu0 %v2781_v16  ;;  %231 = vmatpush1.bf16.msra.mxu1 %v2780_v15  ;;  %v64_v33 = vrot.slane %v3096_v31, %v3091_v30  ;;  %v69_v36 = vrot.slane %v3096_v31, %v3099_v32  ;;  %v2801_v43 = vld [vmem:[%s3687_s4 + $0x24] ss:$8 sps:$4 sm:$0xff]   ;;  %v2799_v44 = vld [vmem:[%s3687_s4 + $0x20] ss:$8 sps:$4 sm:$0xff]   ;;  %v2804_v45 = vld [vmem:[%s3687_s4 + $0x34] ss:$8 sps:$4 sm:$0xff]  }
   0xa   :  { %232 = vmatprep.subr.bf16.mxu1 %v2784_v18  ;;  %v2802_v46 = vld [vmem:[%s3687_s4 + $0x30] ss:$8 sps:$4 sm:$0xff]   ;;  %vm411_vm4 = vcmask 64512  }
   0xb   :  { %v44_v48 = vld [vmem:[%s3688_s1 + $0x10] sm:$0xff]  ;;  %v45_v49 = vld [vmem:[%s3688_s1 + $0x18] sm:$0xff] }
   0xc   :  { %136 = vmatpush1.bf16.msra.mxu0 %v2783_v17  ;;  %v183_v50 = vrot.slane %v44_v48, %v3099_v32  ;;  %v187_v51 = vrot.slane %v45_v49, %v3099_v32  ;;  %v83_v57 = vrot.slane %v44_v48, %v3091_v30  ;;  %v87_v62 = vrot.slane %v45_v49, %v3091_v30 }
   0xd   :  { %137 = vmatprep.subr.bf16.mxu0 %v2787_v19  ;;  %233 = vmatpush1.bf16.msra.mxu1 %v2786_v20  ;;  %v3162_v19 = vand.u32 127, %v37_v27 }
   0xe   :  { %234 = vmatprep.subr.bf16.mxu1 %v2790_v21 }
   0xf   :  { %vm41_vm3 = vcmp.le.s32.totalorder %v3162_v19, %v3088_v29  ;;  %v2887_v19 = vld [vmem:[%s3689_s5 + $0xc0] sm:$0xff]  }
  0x10   :  { %138 = vmatpush1.bf16.msra.mxu0 %v2789_v22 }
  0x11   :  { %325 = vmatprep.subr.bf16.mxu0 %v2795_v24  ;;  %235 = vmatpush1.bf16.msra.mxu1 %v2792_v23 }
  0x12   :  { %2626 = vmatprep.subr.bf16.mxu1 %v2968_v47 }
  0x90   :  { %v49_v2 = vpop.xlane.xlu0 %48 }
  0x91   :  { %v51_v3 = vmul.f32 0.015625, %v49_v2 }
  0x93   :  { %v52_v4 = vsub.f32 %v3028_v0, %v51_v3 }
  0x95   :  { %v53_v5 = vmul.f32 %v52_v4, %v52_v4 }
  0x97   :  { %v54_v6 = vsel %vm46_vm0, %v53_v5, 0.0  ;;  %v3149_v5 = vsub.s32 2, %v3088_v29 }
  0x98   :  { %55 = vadd.xlane.f32.xlu0 %v54_v6 }
  0x99   :  { %v280_v8 = vrot.slane %v44_v48, %v3149_v5  ;;  %v284_v10 = vrot.slane %v45_v49, %v3149_v5  ;;  %v2807_v49 = vld [vmem:[%s3689_s5 + $0x40] sm:$0xff]  }
 0x125   :  { %v56_v25 = vpop.xlane.xlu0 %55 }
 0x126   :  { %v57_v26 = vmul.f32 0.015625, %v56_v25 }
 0x128   :  { %v58_v28 = vadd.f32 1e-05, %v57_v26 }
 0x12a   :  { %2933 = vrsqrt.f32 %v58_v28 }
 0x134   :  { %v2934_v34 = vpop.eup %2933 }
 0x135   :  { %v60_v35 = vmul.f32 %v2934_v34, %v52_v4 }
 0x137   :  { %v65_v37 = vmul.f32 %v64_v33, %v60_v35 }
 0x139   :  { %v70_v38 = vadd.f32 %v69_v36, %v65_v37 }
 0x13b   :  { %v71_v40 = vpack.c.bf16 %v70_v38, %v70_v38 }
 0x13d   :  { %2288 = vmatmul.mubr.msk.bf16.vlgmr.msra.gmra.mrb[0].mxu0 %vm46_vm0, %v71_v40  ;;  %2297 = vmatmul.mubr.msk.bf16.vlgmr.msra.gmra.mrb[0].mxu1 %vm46_vm0, %v71_v40 }
 0x13e   :  { %326 = vmatpush1.bf16.msra.mxu0 %v2793_v39  ;;  %357 = vmatprep.mubr.bf16.mxu0 %v2967_v9 }
 0x13f   :  { %327 = vmatprep.subr.bf16.mxu0 %v2798_v41  ;;  %2628 = vmatprep.mubr.msk.bf16.mxu1 %vm2969_vm1, %v2968_v47 }
 0x142   :  { %328 = vmatpush1.bf16.msra.mxu0 %v2796_v42 }
 0x143   :  { %329 = vmatprep.subr.bf16.mxu0 %v2801_v43 }
 0x146   :  { %330 = vmatpush1.bf16.msra.mxu0 %v2799_v44 }
 0x147   :  { %331 = vmatprep.subr.bf16.mxu0 %v2804_v45 }
 0x14a   :  { %332 = vmatpush1.bf16.msra.mxu0 %v2802_v46 }
 0x14b   :  { %2638 = vmatprep.subr.bf16.mxu0 %v2968_v47 }
 0x14d   :  { %2306 = vmatmul.mubr.msk.bf16.vlgmr.msra.gmra.mrb[4].mxu0 %vm46_vm0, %v71_v40 }
 0x14e   :  { %2640 = vmatprep.mubr.msk.bf16.mxu0 %vm2969_vm1, %v2968_v47 }
 0x210   :  { %v165_v52 = vpop.f32.mrb[0].mxu0  ;;  %v262_v53 = vpop.f32.mrb[0].mxu1 }
 0x211   :  { %v263_v54 = vadd.f32 %v262_v53, %v183_v50  ;;  %v167_v55 = vpop.f32.mrb[1].mxu0  ;;  %v264_v56 = vpop.f32.mrb[1].mxu1  ;;  %v166_v3 = vadd.f32 %v165_v52, %v83_v57  ;;  %v2809_v50 = vld [vmem:[%s3689_s5 + $0x48] sm:$0xff]   ;;  %v2813_v52 = vld [vmem:[%s3689_s5 + $0x58] sm:$0xff]   ;;  %v2815_v53 = vld [vmem:[%s3689_s5 + $0x60] sm:$0xff]  }
 0x212   :  { %v265_v58 = vadd.f32 %v264_v56, %v187_v51  ;;  %v169_v59 = vpop.f32.mrb[2].mxu0  ;;  %v266_v60 = vpop.f32.mrb[2].mxu1  ;;  %v168_v4 = vadd.f32 %v167_v55, %v87_v62  ;;  %v2811_v51 = vld [vmem:[%s3689_s5 + $0x50] sm:$0xff]  }
 0x213   :  { %v367_v61 = vpack.c.bf16 %v263_v54, %v263_v54  ;;  %v170_v63 = vpop.f32.mrb[3].mxu0  ;;  %v267_v1 = vpop.f32.mrb[3].mxu1  ;;  %v366_v6 = vpack.c.bf16 %v166_v3, %v166_v3  ;;  %v2808_v3 = vld [vmem:[%s3689_s5 + $0x10] sm:$0xff]  }
 0x214   :  { %v489_v2 = vpack.c.bf16 %v265_v58, %v265_v58  ;;  %v488_v7 = vpack.c.bf16 %v168_v4, %v168_v4  ;;  %v2805_v63 = vld [vmem:[%s3689_s5] sm:$0xff]   ;;  %v2810_v4 = vld [vmem:[%s3689_s5 + $0x18] sm:$0xff]  }
 0x215   :  { %2627 = vmatpush3.bf16.xpose.msra.mxu1 %v367_v61 }
 0x216   :  { %2639 = vmatpush3.bf16.xpose.msra.mxu0 %v489_v2  ;;  %2632 = vmatprep.subr.bf16.mxu1 %v2968_v47  ;;  %v2806_v2 = vld [vmem:[%s3689_s5 + $0x8] sm:$0xff]  }
 0x217   :  { %2650 = vmatprep.subr.bf16.mxu0 %v2968_v47 }
 0x21c   :  { %2629 = vmatmul.mubr.bf16.vlgmr.msra.gmra.mrb[4].mxu1 %v366_v6  ;;  %v2812_v6 = vld [vmem:[%s3689_s5 + $0x20] sm:$0xff]  }
 0x21d   :  { %2641 = vmatmul.mubr.bf16.vlgmr.msra.gmra.mrb[8].mxu0 %v488_v7  ;;  %2634 = vmatprep.mubr.msk.bf16.mxu1 %vm2969_vm1, %v2968_v47  ;;  %v2814_v7 = vld [vmem:[%s3689_s5 + $0x28] sm:$0xff]  }
 0x21e   :  { %2666 = vmatprep.mubr.msk.bf16.mxu0 %vm2969_vm1, %v2968_v47  ;;  %2651 = vmatpush3.bf16.msra.mxu0 %v2807_v49  ;;  %v2823_v49 = vld [vmem:[%s3690_s6 + $0x4] ss:$8 sps:$4 sm:$0xff]  }
 0x21f   :  { %2652 = vmatprep.subr.bf16.mxu0 %v2968_v47 }
 0x220   :  { %v359_v11 = vpop.f32.mrb[4].mxu0 }
 0x221   :  { %v360_v12 = vadd.f32 %v359_v11, %v280_v8  ;;  %v361_v13 = vpop.f32.mrb[5].mxu0  ;;  %v2816_v8 = vld [vmem:[%s3689_s5 + $0x30] sm:$0xff]   ;;  %v2818_v11 = vld [vmem:[%s3689_s5 + $0x38] sm:$0xff]  }
 0x222   :  { %v3157_v14 = vadd.f32 %v361_v13, %v284_v10  ;;  %v363_v15 = vpop.f32.mrb[6].mxu0  ;;  %2653 = vmatpush3.bf16.msra.mxu0 %v2809_v50  ;;  %v2817_v10 = vld [vmem:[%s3689_s5 + $0x68] sm:$0xff]   ;;  %v2820_v13 = vld [vmem:[%s3689_s5 + $0x78] sm:$0xff]  }
 0x223   :  { %v368_v16 = vpack.c.bf16 %v360_v12, %v360_v12  ;;  %v364_v17 = vpop.f32.mrb[7].mxu0  ;;  %2654 = vmatprep.subr.bf16.mxu0 %v2968_v47  ;;  %v2819_v12 = vld [vmem:[%s3689_s5 + $0x70] sm:$0xff]  }
 0x224   :  { %v490_v57 = vpack.c.bf16 %v3157_v14, %v3157_v14  ;;  %v2826_v50 = vld [vmem:[%s3690_s6 + $0x14] ss:$8 sps:$4 sm:$0xff]  }
 0x225   :  { %v429_v18 = vsel %vm427_vm2, %v368_v16, 0 }
 0x226   :  { %2633 = vmatpush3.bf16.msra.mxu1 %v429_v18  ;;  %2655 = vmatpush3.bf16.msra.mxu0 %v2811_v51  ;;  %v549_v61 = vsel %vm427_vm2, %v490_v57, 0  ;;  %v2824_v51 = vld [vmem:[%s3690_s6 + $0x10] ss:$8 sps:$4 sm:$0xff]  }
 0x227   :  { %2644 = vmatprep.subr.bf16.mxu1 %v2968_v47  ;;  %2656 = vmatprep.subr.bf16.mxu0 %v2968_v47 }
 0x22a   :  { %2657 = vmatpush3.bf16.msra.mxu0 %v2813_v52  ;;  %v2829_v52 = vld [vmem:[%s3690_s6 + $0x24] ss:$8 sps:$4 sm:$0xff]  }
 0x22b   :  { %2658 = vmatprep.subr.bf16.mxu0 %v2968_v47 }
 0x22e   :  { %2659 = vmatpush3.bf16.msra.mxu0 %v2815_v53  ;;  %v2827_v53 = vld [vmem:[%s3690_s6 + $0x20] ss:$8 sps:$4 sm:$0xff]  }
 0x22f   :  { %2660 = vmatprep.subr.bf16.mxu0 %v2968_v47 }
 0x232   :  { %2661 = vmatpush3.bf16.msra.mxu0 %v2817_v10  ;;  %v2837_v10 = vld [vmem:[%s3691_s7 + $0x50] sm:$0xff]  }
 0x233   :  { %2662 = vmatprep.subr.bf16.mxu0 %v2968_v47 }
 0x236   :  { %2663 = vmatpush3.bf16.msra.mxu0 %v2819_v12  ;;  %v2839_v12 = vld [vmem:[%s3691_s7 + $0x58] sm:$0xff]  }
 0x237   :  { %2664 = vmatprep.subr.bf16.mxu0 %v2968_v47 }
 0x23a   :  { %2665 = vmatpush3.bf16.msra.mxu0 %v2820_v13  ;;  %v2840_v13 = vld [vmem:[%s3691_s7 + $0x18] sm:$0xff]  }
 0x23b   :  { %873 = vmatprep.subr.bf16.mxu0 %v2823_v49 }
 0x2ef   :  { %v403_v20 = vpop.f32.mrb[4].mxu1 }
 0x2f0   :  { %v409_v21 = vmul.f32 0.17677669, %v403_v20  ;;  %v2630_v22 = vpop.f32.mrb[5].mxu1  ;;  %v525_v23 = vpop.f32.mrb[8].mxu0 }
 0x2f1   :  { %v531_v24 = vmul.f32 0.17677669, %v525_v23  ;;  %v406_v25 = vpop.f32.mrb[6].mxu1  ;;  %v2642_v26 = vpop.f32.mrb[9].mxu0 }
 0x2f2   :  { %v2631_v28 = vpop.f32.mrb[7].mxu1  ;;  %v528_v33 = vpop.f32.mrb[10].mxu0  ;;  %v410_v34 = vsel %vm41_vm3, %v409_v21, -1e+30 }
 0x2f3   :  { %v2643_v35 = vpop.f32.mrb[11].mxu0  ;;  %v412_v27 = vsel %vm411_vm4, %v410_v34, -inf  ;;  %v532_v36 = vsel %vm41_vm3, %v531_v24, -1e+30 }
 0x2f4   :  { %413 = vmax.xlane.f32.xlu1 %v412_v27  ;;  %v533_v37 = vsel %vm411_vm4, %v532_v36, -inf }
 0x2f8   :  { %534 = vmax.xlane.f32.xlu1 %v533_v37 }
 0x381   :  { %v414_v38 = vpop.xlane.xlu1 %413 }
 0x382   :  { %v415_v39 = vsub.f32 %v410_v34, %v414_v38  ;;  %v787_v34 = vsub.s32 4, %v3088_v29 }
 0x384   :  { %v416_v40 = vmul.f32 1.442695, %v415_v39 }
 0x385   :  { %v535_v41 = vpop.xlane.xlu1 %534 }
 0x386   :  { %2935 = vpow2.f32 %v416_v40  ;;  %v536_v42 = vsub.f32 %v532_v36, %v535_v41  ;;  %v788_v36 = vrot.slane %v3096_v31, %v787_v34 }
 0x388   :  { %v537_v43 = vmul.f32 1.442695, %v536_v42 }
 0x38a   :  { %2937 = vpow2.f32 %v537_v43 }
 0x390   :  { %v2936_v44 = vpop.eup %2935 }
 0x391   :  { %v418_v45 = vsel %vm411_vm4, %v2936_v44, 0.0 }
 0x392   :  { %419 = vadd.xlane.f32.xlu0 %v418_v45 }
 0x394   :  { %v2938_v46 = vpop.eup %2937 }
 0x395   :  { %v539_v48 = vsel %vm411_vm4, %v2938_v46, 0.0 }
 0x396   :  { %540 = vadd.xlane.f32.xlu1 %v539_v48 }
 0x41f   :  { %v420_v54 = vpop.xlane.xlu0 %419 }
 0x420   :  { %2939 = vrcp.f32 %v420_v54  ;;  %v2832_v54 = vld [vmem:[%s3690_s6 + $0x34] ss:$8 sps:$4 sm:$0xff]  }
 0x423   :  { %v541_v55 = vpop.xlane.xlu1 %540 }
 0x424   :  { %2941 = vrcp.f32 %v541_v55  ;;  %v2830_v55 = vld [vmem:[%s3690_s6 + $0x30] ss:$8 sps:$4 sm:$0xff]  }
 0x42a   :  { %v2940_v56 = vpop.eup %2939 }
 0x42b   :  { %v422_v58 = vmul.f32 %v2940_v56, %v2936_v44 }
 0x42d   :  { %v423_v59 = vpack.c.bf16 %v422_v58, %v422_v58 }
 0x42e   :  { %v2942_v60 = vpop.eup %2941 }
 0x42f   :  { %2635 = vmatmul.mubr.msk.bf16.vlgmr.msra.gmra.mrb[8].mxu1 %vm411_vm4, %v423_v59  ;;  %v543_v62 = vmul.f32 %v2942_v60, %v2938_v46  ;;  %v810_v59 = vsub.s32 3, %v3088_v29  ;;  %v806_v60 = vrot.slane %v3096_v31, %v3149_v5 }
 0x430   :  { %2645 = vmatpush3.bf16.msra.mxu1 %v549_v61  ;;  %2646 = vmatprep.mubr.msk.bf16.mxu1 %vm2969_vm1, %v2968_v47 }
 0x431   :  { %2670 = vmatprep.subr.bf16.mxu1 %v2968_v47  ;;  %v544_v1 = vpack.c.bf16 %v543_v62, %v543_v62 }
 0x437   :  { %2647 = vmatmul.mubr.msk.bf16.vlgmr.msra.gmra.mrb[12].mxu1 %vm411_vm4, %v544_v1 }
 0x438   :  { %2671 = vmatpush3.bf16.msra.mxu1 %v2805_v63  ;;  %2686 = vmatprep.mubr.msk.bf16.mxu1 %vm2969_vm1, %v2968_v47  ;;  %v811_v63 = vrot.slane %v3096_v31, %v810_v59 }
 0x439   :  { %2672 = vmatprep.subr.bf16.mxu1 %v2968_v47 }
 0x43c   :  { %2673 = vmatpush3.bf16.msra.mxu1 %v2806_v2 }
 0x43d   :  { %2674 = vmatprep.subr.bf16.mxu1 %v2968_v47 }
 0x440   :  { %2675 = vmatpush3.bf16.msra.mxu1 %v2808_v3 }
 0x441   :  { %2676 = vmatprep.subr.bf16.mxu1 %v2968_v47 }
 0x444   :  { %2677 = vmatpush3.bf16.msra.mxu1 %v2810_v4  ;;  %v2833_v4 = vld [vmem:[%s3691_s7 + $0x40] sm:$0xff]  }
 0x445   :  { %2678 = vmatprep.subr.bf16.mxu1 %v2968_v47 }
 0x448   :  { %2679 = vmatpush3.bf16.msra.mxu1 %v2812_v6  ;;  %v2834_v6 = vld [vmem:[%s3691_s7] sm:$0xff]  }
 0x449   :  { %2680 = vmatprep.subr.bf16.mxu1 %v2968_v47 }
 0x44c   :  { %2681 = vmatpush3.bf16.msra.mxu1 %v2814_v7  ;;  %v2835_v7 = vld [vmem:[%s3691_s7 + $0x48] sm:$0xff]  }
 0x44d   :  { %2682 = vmatprep.subr.bf16.mxu1 %v2968_v47 }
 0x450   :  { %2683 = vmatpush3.bf16.msra.mxu1 %v2816_v8  ;;  %v2836_v8 = vld [vmem:[%s3691_s7 + $0x8] sm:$0xff]  }
 0x451   :  { %2684 = vmatprep.subr.bf16.mxu1 %v2968_v47 }
 0x454   :  { %2685 = vmatpush3.bf16.msra.mxu1 %v2818_v11  ;;  %v2838_v11 = vld [vmem:[%s3691_s7 + $0x10] sm:$0xff]  }
 0x455   :  { %2551 = vmatprep.subr.bf16.mxu1 %v2833_v4 }
 0x502   :  { %v465_v14 = vpop.f32.mrb[8].mxu1 }
 0x503   :  { %v471_v15 = vpack.c.bf16 %v465_v14, %v465_v14  ;;  %v2636_v16 = vpop.f32.mrb[9].mxu1  ;;  %v2841_v14 = vld [vmem:[%s3691_s7 + $0x60] sm:$0xff]  }
 0x504   :  { %v468_v17 = vpop.f32.mrb[10].mxu1  ;;  %v2843_v16 = vld [vmem:[%s3691_s7 + $0x68] sm:$0xff]  }
 0x505   :  { %v2637_v18 = vpop.f32.mrb[11].mxu1  ;;  %2687 = vmatmul.mubr.bf16.vlgmr.msra.gmra.mrb[16].mxu1 %v471_v15  ;;  %v2842_v15 = vld [vmem:[%s3691_s7 + $0x20] sm:$0xff]   ;;  %v2844_v17 = vld [vmem:[%s3691_s7 + $0x28] sm:$0xff]  }
 0x506   :  { %2552 = vmatpush3.bf16.msra.mxu1 %v2834_v6  ;;  %v2845_v18 = vld [vmem:[%s3691_s7 + $0x70] sm:$0xff]  }
 0x507   :  { %2553 = vmatprep.subr.bf16.mxu1 %v2835_v7 }
 0x50a   :  { %v585_v20 = vpop.f32.mrb[12].mxu1  ;;  %2554 = vmatpush3.bf16.msra.mxu1 %v2836_v8 }
 0x50b   :  { %v591_v21 = vpack.c.bf16 %v585_v20, %v585_v20  ;;  %v2648_v22 = vpop.f32.mrb[13].mxu1  ;;  %2555 = vmatprep.subr.bf16.mxu1 %v2837_v10  ;;  %v2846_v20 = vld [vmem:[%s3691_s7 + $0x30] sm:$0xff]  }
 0x50c   :  { %v588_v23 = vpop.f32.mrb[14].mxu1  ;;  %v2848_v22 = vld [vmem:[%s3691_s7 + $0x38] sm:$0xff]  }
 0x50d   :  { %v2649_v24 = vpop.f32.mrb[15].mxu1  ;;  %2667 = vmatmul.mubr.bf16.vlgmr.msra.gmra.mrb[12].mxu0 %v591_v21  ;;  %v2847_v21 = vld [vmem:[%s3691_s7 + $0x78] sm:$0xff]   ;;  %v3341_v23 = vsub.s32 6, %v3088_v29 }
 0x50e   :  { %905 = vmatprep.mubr.bf16.mxu0 %v2967_v9  ;;  %2556 = vmatpush3.bf16.msra.mxu1 %v2838_v11  ;;  %v43_v24 = vld [vmem:[%s3688_s1 + $0x8] sm:$0xff] }
 0x50f   :  { %2557 = vmatprep.subr.bf16.mxu1 %v2839_v12 }
 0x512   :  { %2558 = vmatpush3.bf16.msra.mxu1 %v2840_v13 }
 0x513   :  { %2559 = vmatprep.subr.bf16.mxu1 %v2841_v14  ;;  %v2854_v14 = vld [vmem:[%s3687_s4 + $0x44] ss:$8 sps:$4 sm:$0xff]  }
 0x516   :  { %2560 = vmatpush3.bf16.msra.mxu1 %v2842_v15  ;;  %v2852_v15 = vld [vmem:[%s3687_s4 + $0x40] ss:$8 sps:$4 sm:$0xff]  }
 0x517   :  { %2561 = vmatprep.subr.bf16.mxu1 %v2843_v16  ;;  %v2857_v16 = vld [vmem:[%s3685_s2 + $0x54] ss:$8 sps:$4 sm:$0xff]  }
 0x51a   :  { %2562 = vmatpush3.bf16.msra.mxu1 %v2844_v17  ;;  %v2855_v17 = vld [vmem:[%s3685_s2 + $0x50] ss:$8 sps:$4 sm:$0xff]  }
 0x51b   :  { %2563 = vmatprep.subr.bf16.mxu1 %v2845_v18  ;;  %v2860_v18 = vld [vmem:[%s3687_s4 + $0x54] ss:$8 sps:$4 sm:$0xff]  }
 0x51e   :  { %2564 = vmatpush3.bf16.msra.mxu1 %v2846_v20  ;;  %v2858_v20 = vld [vmem:[%s3687_s4 + $0x50] ss:$8 sps:$4 sm:$0xff]  }
 0x51f   :  { %2565 = vmatprep.subr.bf16.mxu1 %v2847_v21  ;;  %v2863_v21 = vld [vmem:[%s3685_s2 + $0x64] ss:$8 sps:$4 sm:$0xff]  }
 0x522   :  { %2566 = vmatpush3.bf16.msra.mxu1 %v2848_v22  ;;  %v2861_v22 = vld [vmem:[%s3685_s2 + $0x60] ss:$8 sps:$4 sm:$0xff]  }
 0x523   :  { %1392 = vmatprep.subr.bf16.mxu1 %v2854_v14 }
 0x5d8   :  { %v778_v25 = vpop.f32.mrb[16].mxu1 }
 0x5d9   :  { %v2688_v26 = vpop.f32.mrb[17].mxu1 }
 0x5da   :  { %v781_v28 = vpop.f32.mrb[18].mxu1  ;;  %v829_v26 = vrot.slane %v43_v24, %v3341_v23  ;;  %v2866_v24 = vld [vmem:[%s3687_s4 + $0x64] ss:$8 sps:$4 sm:$0xff]  }
 0x5db   :  { %v2689_v33 = vpop.f32.mrb[19].mxu1 }
 0x5e0   :  { %v690_v35 = vpop.f32.mrb[12].mxu0 }
 0x5e1   :  { %v779_v27 = vadd.f32 %v778_v25, %v690_v35  ;;  %v2668_v37 = vpop.f32.mrb[13].mxu0  ;;  %v825_v25 = vrot.slane %v3096_v31, %v3341_v23 }
 0x5e2   :  { %v693_v38 = vpop.f32.mrb[14].mxu0 }
 0x5e3   :  { %v784_v39 = vadd.f32 %v779_v27, %v3028_v0  ;;  %v2669_v40 = vpop.f32.mrb[15].mxu0  ;;  %v2821_v0 = vld [vmem:[%s3690_s6] ss:$8 sps:$4 sm:$0xff]  }
 0x5e4   :  { %874 = vmatpush1.bf16.msra.mxu0 %v2821_v0 }
 0x5e5   :  { %v3254_v41 = vadd.f32 %v788_v36, %v784_v39  ;;  %875 = vmatprep.subr.bf16.mxu0 %v2826_v50 }
 0x5e7   :  { %v790_v42 = vsel %vm46_vm0, %v3254_v41, 0.0 }
 0x5e8   :  { %791 = vadd.xlane.f32.xlu0 %v790_v42  ;;  %876 = vmatpush1.bf16.msra.mxu0 %v2824_v51 }
 0x5e9   :  { %877 = vmatprep.subr.bf16.mxu0 %v2829_v52 }
 0x5ec   :  { %878 = vmatpush1.bf16.msra.mxu0 %v2827_v53 }
 0x5ed   :  { %879 = vmatprep.subr.bf16.mxu0 %v2832_v54 }
 0x5f0   :  { %880 = vmatpush1.bf16.msra.mxu0 %v2830_v55 }
 0x675   :  { %v792_v43 = vpop.xlane.xlu0 %791 }
 0x676   :  { %v793_v44 = vmul.f32 0.015625, %v792_v43 }
 0x678   :  { %v794_v45 = vsub.f32 %v3254_v41, %v793_v44 }
 0x67a   :  { %v795_v46 = vmul.f32 %v794_v45, %v794_v45 }
 0x67c   :  { %v796_v48 = vsel %vm46_vm0, %v795_v46, 0.0 }
 0x67d   :  { %797 = vadd.xlane.f32.xlu1 %v796_v48 }
 0x70a   :  { %v798_v56 = vpop.xlane.xlu1 %797 }
 0x70b   :  { %v799_v57 = vmul.f32 0.015625, %v798_v56 }
 0x70d   :  { %v800_v58 = vadd.f32 1e-05, %v799_v57 }
 0x70f   :  { %2943 = vrsqrt.f32 %v800_v58 }
 0x719   :  { %v2944_v61 = vpop.eup %2943 }
 0x71a   :  { %v802_v62 = vmul.f32 %v2944_v61, %v794_v45 }
 0x71c   :  { %v807_v1 = vmul.f32 %v806_v60, %v802_v62  ;;  %v968_v60 = vsub.s32 5, %v3088_v29  ;;  %v2929_v29 = vld [vmem:[%s3692_s9] sm:$0xff]  }
 0x71e   :  { %v812_v2 = vadd.f32 %v811_v63, %v807_v1  ;;  %v969_v62 = vrot.slane %v3096_v31, %v968_v60  ;;  %v2851_v31 = vld [vmem:[%s3685_s2 + $0x44] ss:$8 sps:$4 sm:$0xff]  }
 0x71f   :  { %1196 = vmatprep.subr.bf16.mxu0 %v2851_v31 }
 0x720   :  { %v813_v3 = vpack.c.bf16 %v812_v2, %v812_v2 }
 0x722   :  { %2333 = vmatmul.mubr.msk.bf16.vlgmr.msra.gmra.mrb[16].mxu0 %vm46_vm0, %v813_v3 }
 0x723   :  { %1228 = vmatprep.mubr.bf16.mxu0 %v2967_v9 }
 0x7f5   :  { %v907_v28 = vpop.f32.mrb[16].mxu0 }
 0x7f6   :  { %v908_v33 = vadd.f32 %v907_v28, %v825_v25  ;;  %v909_v35 = vpop.f32.mrb[17].mxu0  ;;  %v2864_v25 = vld [vmem:[%s3687_s4 + $0x60] ss:$8 sps:$4 sm:$0xff]   ;;  %v2867_v28 = vld [vmem:[%s3685_s2 + $0x70] ss:$8 sps:$4 sm:$0xff]  }
 0x7f7   :  { %v910_v27 = vadd.f32 %v909_v35, %v829_v26  ;;  %v911_v36 = vpop.f32.mrb[18].mxu0  ;;  %v2869_v26 = vld [vmem:[%s3685_s2 + $0x74] ss:$8 sps:$4 sm:$0xff]   ;;  %v2870_v35 = vld [vmem:[%s3687_s4 + $0x70] ss:$8 sps:$4 sm:$0xff]  }
 0x7f8   :  { %v916_v37 = vmul.f32 0.044715, %v908_v33  ;;  %v912_v38 = vpop.f32.mrb[19].mxu0  ;;  %v914_v51 = vmul.f32 0.5, %v908_v33 }
 0x7f9   :  { %v917_v39 = vmul.f32 0.044715, %v910_v27  ;;  %v915_v53 = vmul.f32 0.5, %v910_v27 }
 0x7fa   :  { %v918_v40 = vmul.f32 %v916_v37, %v908_v33 }
 0x7fb   :  { %v919_v42 = vmul.f32 %v917_v39, %v910_v27  ;;  %v3416_v39 = vld [vmem:[%s3688_s1 + $0x20] sm:$0xff] }
 0x7fc   :  { %v920_v43 = vmul.f32 %v918_v40, %v908_v33  ;;  %v1128_v40 = vrot.slane %v3416_v39, %v3091_v30 }
 0x7fd   :  { %v921_v44 = vmul.f32 %v919_v42, %v910_v27 }
 0x7fe   :  { %v922_v45 = vadd.f32 %v920_v43, %v908_v33  ;;  %v2872_v33 = vld [vmem:[%s3687_s4 + $0x74] ss:$8 sps:$4 sm:$0xff]  }
 0x7ff   :  { %v923_v46 = vadd.f32 %v921_v44, %v910_v27  ;;  %v2875_v27 = vld [vmem:[%s3686_s3 + $0x44] ss:$8 sps:$4 sm:$0xff]   ;;  %v1133_v44 = vrot.slane %v3416_v39, %v3099_v32 }
 0x800   :  { %v924_v48 = vmul.f32 0.7978846, %v922_v45 }
 0x801   :  { %v925_v49 = vmul.f32 0.7978846, %v923_v46 }
 0x802   :  { %2945 = vtanh.f32 %v924_v48  ;;  %v2873_v48 = vld [vmem:[%s3686_s3 + $0x40] ss:$8 sps:$4 sm:$0xff]  }
 0x803   :  { %2947 = vtanh.f32 %v925_v49 }
 0x80c   :  { %v2946_v0 = vpop.eup %2945 }
 0x80d   :  { %v2948_v50 = vpop.eup %2947  ;;  %v928_v52 = vadd.f32 1.0, %v2946_v0  ;;  %v2878_v0 = vld [vmem:[%s3686_s3 + $0x54] ss:$8 sps:$4 sm:$0xff]  }
 0x80e   :  { %v929_v54 = vadd.f32 1.0, %v2948_v50  ;;  %v2876_v50 = vld [vmem:[%s3686_s3 + $0x50] ss:$8 sps:$4 sm:$0xff]  }
 0x80f   :  { %v930_v55 = vmul.f32 %v928_v52, %v914_v51  ;;  %v2881_v51 = vld [vmem:[%s3686_s3 + $0x64] ss:$8 sps:$4 sm:$0xff]   ;;  %v2879_v52 = vld [vmem:[%s3686_s3 + $0x60] ss:$8 sps:$4 sm:$0xff]  }
 0x810   :  { %v931_v56 = vmul.f32 %v929_v54, %v915_v53  ;;  %v2884_v53 = vld [vmem:[%s3686_s3 + $0x74] ss:$8 sps:$4 sm:$0xff]   ;;  %v2882_v54 = vld [vmem:[%s3686_s3 + $0x70] ss:$8 sps:$4 sm:$0xff]  }
 0x811   :  { %v932_v58 = vpack.c.bf16 %v930_v55, %v930_v55  ;;  %v2352_v55 = vld [vmem:[%s3688_s1 + $0x30] sm:$0xff] }
 0x812   :  { %v933_v57 = vpack.c.bf16 %v931_v56, %v931_v56  ;;  %v2353_v56 = vld [vmem:[%s3688_s1 + $0x38] sm:$0xff] }
 0x814   :  { %1098 = vmatprep.mubr.bf16.mxu1 %v933_v57  ;;  %v1347_v57 = vrot.slane %v2352_v55, %v3149_v5 }
 0x815   :  { %1099 = vmatmul.mubr.bf16.vlgmr.msra.gmra.mrb[20].mxu1 %v932_v58  ;;  %v1351_v58 = vrot.slane %v2353_v56, %v3149_v5 }
 0x816   :  { %1424 = vmatprep.mubr.bf16.mxu1 %v2967_v9  ;;  %1393 = vmatpush1.bf16.msra.mxu1 %v2852_v15  ;;  %v1148_v15 = vrot.slane %v2352_v55, %v3091_v30 }
 0x817   :  { %1394 = vmatprep.subr.bf16.mxu1 %v2860_v18  ;;  %v1253_v18 = vrot.slane %v2353_v56, %v3099_v32 }
 0x81a   :  { %1395 = vmatpush1.bf16.msra.mxu1 %v2858_v20 }
 0x81b   :  { %1396 = vmatprep.subr.bf16.mxu1 %v2866_v24 }
 0x81e   :  { %1397 = vmatpush1.bf16.msra.mxu1 %v2864_v25  ;;  %v1152_v25 = vrot.slane %v2353_v56, %v3091_v30 }
 0x81f   :  { %1398 = vmatprep.subr.bf16.mxu1 %v2872_v33 }
 0x822   :  { %1399 = vmatpush1.bf16.msra.mxu1 %v2870_v35 }
 0x823   :  { %2696 = vmatprep.subr.bf16.mxu1 %v2968_v47 }
 0x8e8   :  { %v2567_v61 = vpop.f32.mrb[20].mxu1 }
 0x8e9   :  { %v2568_v63 = vpop.f32.mrb[21].mxu1 }
 0x8ea   :  { %v2569_v1 = vadd.f32 %v2568_v63, %v2567_v61  ;;  %v2570_v2 = vpop.f32.mrb[22].mxu1 }
 0x8eb   :  { %v2571_v3 = vpop.f32.mrb[23].mxu1 }
 0x8ec   :  { %v1101_v4 = vadd.f32 %v2569_v1, %v969_v62 }
 0x8ee   :  { %v3355_v6 = vadd.f32 %v1101_v4, %v3254_v41  ;;  %v2849_v41 = vld [vmem:[%s3685_s2 + $0x40] ss:$8 sps:$4 sm:$0xff]  }
 0x8ef   :  { %1197 = vmatpush1.bf16.msra.mxu0 %v2849_v41 }
 0x8f0   :  { %v1112_v7 = vsel %vm46_vm0, %v3355_v6, 0.0  ;;  %1198 = vmatprep.subr.bf16.mxu0 %v2857_v16 }
 0x8f1   :  { %1113 = vadd.xlane.f32.xlu0 %v1112_v7 }
 0x8f3   :  { %1199 = vmatpush1.bf16.msra.mxu0 %v2855_v17 }
 0x8f4   :  { %1200 = vmatprep.subr.bf16.mxu0 %v2863_v21 }
 0x8f7   :  { %1201 = vmatpush1.bf16.msra.mxu0 %v2861_v22 }
 0x8f8   :  { %1202 = vmatprep.subr.bf16.mxu0 %v2869_v26 }
 0x8fb   :  { %1203 = vmatpush1.bf16.msra.mxu0 %v2867_v28 }
 0x8fc   :  { %1294 = vmatprep.subr.bf16.mxu0 %v2875_v27 }
 0x97e   :  { %v1114_v8 = vpop.xlane.xlu0 %1113 }
 0x97f   :  { %v1115_v10 = vmul.f32 0.015625, %v1114_v8 }
 0x981   :  { %v1116_v11 = vsub.f32 %v3355_v6, %v1115_v10 }
 0x983   :  { %v1117_v12 = vmul.f32 %v1116_v11, %v1116_v11 }
 0x985   :  { %v1118_v13 = vsel %vm46_vm0, %v1117_v12, 0.0 }
 0x986   :  { %1119 = vadd.xlane.f32.xlu1 %v1118_v13  ;;  %v1249_v13 = vrot.slane %v2352_v55, %v3099_v32 }
 0xa13   :  { %v1120_v36 = vpop.xlane.xlu1 %1119 }
 0xa14   :  { %v1121_v37 = vmul.f32 0.015625, %v1120_v36 }
 0xa16   :  { %v1122_v38 = vadd.f32 1e-05, %v1121_v37 }
 0xa18   :  { %2949 = vrsqrt.f32 %v1122_v38 }
 0xa22   :  { %v2950_v42 = vpop.eup %2949 }
 0xa23   :  { %v1124_v43 = vmul.f32 %v2950_v42, %v1116_v11 }
 0xa25   :  { %v1129_v45 = vmul.f32 %v1128_v40, %v1124_v43 }
 0xa27   :  { %v1134_v46 = vadd.f32 %v1133_v44, %v1129_v45 }
 0xa29   :  { %v1135_v49 = vpack.c.bf16 %v1134_v46, %v1134_v46 }
 0xa2b   :  { %2370 = vmatmul.mubr.msk.bf16.vlgmr.msra.gmra.mrb[20].mxu0 %vm46_vm0, %v1135_v49  ;;  %2404 = vmatmul.mubr.msk.bf16.vlgmr.msra.gmra.mrb[24].mxu1 %vm46_vm0, %v1135_v49 }
 0xa2c   :  { %1295 = vmatpush1.bf16.msra.mxu0 %v2873_v48  ;;  %1326 = vmatprep.mubr.bf16.mxu0 %v2967_v9 }
 0xa2d   :  { %1296 = vmatprep.subr.bf16.mxu0 %v2878_v0  ;;  %2698 = vmatprep.mubr.msk.bf16.mxu1 %vm2969_vm1, %v2968_v47 }
 0xa30   :  { %1297 = vmatpush1.bf16.msra.mxu0 %v2876_v50 }
 0xa31   :  { %1298 = vmatprep.subr.bf16.mxu0 %v2881_v51 }
 0xa34   :  { %1299 = vmatpush1.bf16.msra.mxu0 %v2879_v52 }
 0xa35   :  { %1300 = vmatprep.subr.bf16.mxu0 %v2884_v53 }
 0xa38   :  { %1301 = vmatpush1.bf16.msra.mxu0 %v2882_v54 }
 0xa39   :  { %2690 = vmatprep.subr.bf16.mxu0 %v2968_v47 }
 0xa3b   :  { %2387 = vmatmul.mubr.msk.bf16.vlgmr.msra.gmra.mrb[24].mxu0 %vm46_vm0, %v1135_v49 }
 0xa3c   :  { %2692 = vmatprep.mubr.msk.bf16.mxu0 %vm2969_vm1, %v2968_v47 }
 0xafe   :  { %v1230_v61 = vpop.f32.mrb[20].mxu0  ;;  %v1426_v62 = vpop.f32.mrb[24].mxu1 }
 0xaff   :  { %v1427_v63 = vadd.f32 %v1426_v62, %v1347_v57  ;;  %v1232_v1 = vpop.f32.mrb[21].mxu0  ;;  %v1428_v2 = vpop.f32.mrb[25].mxu1  ;;  %v1231_v21 = vadd.f32 %v1230_v61, %v1148_v15  ;;  %v2889_v62 = vld [vmem:[%s3689_s5 + $0xc8] sm:$0xff]  }
 0xb00   :  { %v3460_v3 = vadd.f32 %v1428_v2, %v1351_v58  ;;  %v1234_v4 = vpop.f32.mrb[22].mxu0  ;;  %v1430_v7 = vpop.f32.mrb[26].mxu1  ;;  %v1233_v28 = vadd.f32 %v1232_v1, %v1152_v25  ;;  %v2893_v1 = vld [vmem:[%s3689_s5 + $0xd8] sm:$0xff]   ;;  %v2895_v2 = vld [vmem:[%s3689_s5 + $0xe0] sm:$0xff]   ;;  %v2899_v25 = vld [vmem:[%s3689_s5 + $0xf0] sm:$0xff]  }
 0xb01   :  { %v1435_v8 = vpack.c.bf16 %v1427_v63, %v1427_v63  ;;  %v1235_v10 = vpop.f32.mrb[23].mxu0  ;;  %v1431_v11 = vpop.f32.mrb[27].mxu1  ;;  %v1433_v24 = vpack.c.bf16 %v1231_v21, %v1231_v21  ;;  %v2891_v63 = vld [vmem:[%s3689_s5 + $0xd0] sm:$0xff]  }
 0xb02   :  { %v1554_v33 = vpack.c.bf16 %v1233_v28, %v1233_v28  ;;  %v1556_v10 = vpack.c.bf16 %v3460_v3, %v3460_v3  ;;  %v2886_v3 = vld [vmem:[%s3689_s5 + $0x88] sm:$0xff]   ;;  %v2896_v21 = vld [vmem:[%s3689_s5 + $0xb0] sm:$0xff]  }
 0xb03   :  { %v1494_v12 = vsel %vm427_vm2, %v1435_v8, 0 }
 0xb04   :  { %2697 = vmatpush3.bf16.msra.mxu1 %v1494_v12 }
 0xb05   :  { %2708 = vmatprep.subr.bf16.mxu1 %v2968_v47 }
 0xb0e   :  { %v1328_v31 = vpop.f32.mrb[24].mxu0 }
 0xb0f   :  { %v1329_v41 = vadd.f32 %v1328_v31, %v1249_v13  ;;  %v1330_v14 = vpop.f32.mrb[25].mxu0  ;;  %v1615_v13 = vsel %vm427_vm2, %v1556_v10, 0 }
 0xb10   :  { %v1332_v16 = vpop.f32.mrb[26].mxu0  ;;  %v1331_v22 = vadd.f32 %v1330_v14, %v1253_v18  ;;  %v2885_v14 = vld [vmem:[%s3689_s5 + $0x80] sm:$0xff]  }
 0xb11   :  { %v1434_v17 = vpack.c.bf16 %v1329_v41, %v1329_v41  ;;  %v1333_v20 = vpop.f32.mrb[27].mxu0  ;;  %v2888_v16 = vld [vmem:[%s3689_s5 + $0x90] sm:$0xff]   ;;  %v2892_v18 = vld [vmem:[%s3689_s5 + $0xa0] sm:$0xff]  }
 0xb12   :  { %v1555_v26 = vpack.c.bf16 %v1331_v22, %v1331_v22  ;;  %v2894_v20 = vld [vmem:[%s3689_s5 + $0xa8] sm:$0xff]  }
 0xb13   :  { %2691 = vmatpush3.bf16.xpose.msra.mxu0 %v1434_v17  ;;  %v2890_v17 = vld [vmem:[%s3689_s5 + $0x98] sm:$0xff]   ;;  %v2897_v22 = vld [vmem:[%s3689_s5 + $0xe8] sm:$0xff]  }
 0xb14   :  { %2702 = vmatprep.subr.bf16.mxu0 %v2968_v47 }
 0xb1a   :  { %2693 = vmatmul.mubr.bf16.vlgmr.msra.gmra.mrb[28].mxu0 %v1433_v24  ;;  %v2898_v24 = vld [vmem:[%s3689_s5 + $0xb8] sm:$0xff]  }
 0xb1b   :  { %2703 = vmatpush3.bf16.xpose.msra.mxu0 %v1555_v26  ;;  %2704 = vmatprep.mubr.msk.bf16.mxu0 %vm2969_vm1, %v2968_v47  ;;  %v2900_v26 = vld [vmem:[%s3689_s5 + $0xf8] sm:$0xff]  }
 0xb1c   :  { %2714 = vmatprep.subr.bf16.mxu0 %v2968_v47 }
 0xb22   :  { %2705 = vmatmul.mubr.bf16.vlgmr.msra.gmra.mrb[32].mxu0 %v1554_v33 }
 0xb23   :  { %2730 = vmatprep.mubr.msk.bf16.mxu0 %vm2969_vm1, %v2968_v47  ;;  %2715 = vmatpush3.bf16.msra.mxu0 %v2887_v19 }
 0xb24   :  { %2716 = vmatprep.subr.bf16.mxu0 %v2968_v47 }
 0xb27   :  { %2717 = vmatpush3.bf16.msra.mxu0 %v2889_v62  ;;  %v2906_v62 = vld [vmem:[%s3690_s6 + $0x54] ss:$8 sps:$4 sm:$0xff]  }
 0xb28   :  { %2718 = vmatprep.subr.bf16.mxu0 %v2968_v47 }
 0xb2b   :  { %2719 = vmatpush3.bf16.msra.mxu0 %v2891_v63  ;;  %v2904_v63 = vld [vmem:[%s3690_s6 + $0x50] ss:$8 sps:$4 sm:$0xff]  }
 0xb2c   :  { %2720 = vmatprep.subr.bf16.mxu0 %v2968_v47 }
 0xb2f   :  { %2721 = vmatpush3.bf16.msra.mxu0 %v2893_v1  ;;  %v2909_v1 = vld [vmem:[%s3690_s6 + $0x64] ss:$8 sps:$4 sm:$0xff]  }
 0xb30   :  { %2722 = vmatprep.subr.bf16.mxu0 %v2968_v47 }
 0xb33   :  { %2723 = vmatpush3.bf16.msra.mxu0 %v2895_v2  ;;  %v2907_v2 = vld [vmem:[%s3690_s6 + $0x60] ss:$8 sps:$4 sm:$0xff]  }
 0xb34   :  { %2724 = vmatprep.subr.bf16.mxu0 %v2968_v47 }
 0xb37   :  { %2725 = vmatpush3.bf16.msra.mxu0 %v2897_v22  ;;  %v2920_v22 = vld [vmem:[%s3691_s7 + $0x98] sm:$0xff]  }
 0xb38   :  { %2726 = vmatprep.subr.bf16.mxu0 %v2968_v47 }
 0xb3b   :  { %2727 = vmatpush3.bf16.msra.mxu0 %v2899_v25  ;;  %v2922_v25 = vld [vmem:[%s3691_s7 + $0xa0] sm:$0xff]  }
 0xb3c   :  { %2728 = vmatprep.subr.bf16.mxu0 %v2968_v47 }
 0xb3f   :  { %2729 = vmatpush3.bf16.msra.mxu0 %v2900_v26  ;;  %v2923_v26 = vld [vmem:[%s3691_s7 + $0xe8] sm:$0xff]  }
 0xbed   :  { %v1470_v35 = vpop.f32.mrb[28].mxu0 }
 0xbee   :  { %v1476_v27 = vmul.f32 0.17677669, %v1470_v35  ;;  %v2694_v36 = vpop.f32.mrb[29].mxu0 }
 0xbef   :  { %v1473_v37 = vpop.f32.mrb[30].mxu0 }
 0xbf0   :  { %v2695_v38 = vpop.f32.mrb[31].mxu0  ;;  %v1477_v40 = vsel %vm41_vm3, %v1476_v27, -1e+30 }
 0xbf1   :  { %v1478_v42 = vsel %vm411_vm4, %v1477_v40, -inf }
 0xbf2   :  { %1479 = vmax.xlane.f32.xlu0 %v1478_v42 }
 0xbf5   :  { %v1591_v43 = vpop.f32.mrb[32].mxu0 }
 0xbf6   :  { %v1597_v44 = vmul.f32 0.17677669, %v1591_v43  ;;  %v2706_v45 = vpop.f32.mrb[33].mxu0 }
 0xbf7   :  { %v1594_v46 = vpop.f32.mrb[34].mxu0 }
 0xbf8   :  { %v2707_v48 = vpop.f32.mrb[35].mxu0  ;;  %v1598_v49 = vsel %vm41_vm3, %v1597_v44, -1e+30 }
 0xbf9   :  { %v1599_v0 = vsel %vm411_vm4, %v1598_v49, -inf }
 0xbfa   :  { %1600 = vmax.xlane.f32.xlu1 %v1599_v0 }
 0xc7f   :  { %v1480_v50 = vpop.xlane.xlu0 %1479 }
 0xc80   :  { %v1481_v51 = vsub.f32 %v1477_v40, %v1480_v50  ;;  %v1854_v50 = vrot.slane %v3416_v39, %v787_v34  ;;  %v2903_v34 = vld [vmem:[%s3690_s6 + $0x44] ss:$8 sps:$4 sm:$0xff]  }
 0xc81   :  { %1940 = vmatprep.subr.bf16.mxu0 %v2903_v34 }
 0xc82   :  { %v1482_v52 = vmul.f32 1.442695, %v1481_v51 }
 0xc84   :  { %2951 = vpow2.f32 %v1482_v52 }
 0xc87   :  { %v1601_v53 = vpop.xlane.xlu1 %1600 }
 0xc88   :  { %v1602_v54 = vsub.f32 %v1598_v49, %v1601_v53 }
 0xc8a   :  { %v1603_v55 = vmul.f32 1.442695, %v1602_v54 }
 0xc8c   :  { %2953 = vpow2.f32 %v1603_v55 }
 0xc8e   :  { %v2952_v56 = vpop.eup %2951 }
 0xc8f   :  { %v1484_v57 = vsel %vm411_vm4, %v2952_v56, 0.0 }
 0xc90   :  { %1485 = vadd.xlane.f32.xlu0 %v1484_v57 }
 0xc96   :  { %v2954_v58 = vpop.eup %2953 }
 0xc97   :  { %v1605_v61 = vsel %vm411_vm4, %v2954_v58, 0.0 }
 0xc98   :  { %1606 = vadd.xlane.f32.xlu1 %v1605_v61 }
 0xd1d   :  { %v1486_v4 = vpop.xlane.xlu0 %1485 }
 0xd1e   :  { %2955 = vrcp.f32 %v1486_v4  ;;  %v2912_v4 = vld [vmem:[%s3690_s6 + $0x74] ss:$8 sps:$4 sm:$0xff]  }
 0xd25   :  { %v1607_v7 = vpop.xlane.xlu1 %1606 }
 0xd26   :  { %2957 = vrcp.f32 %v1607_v7  ;;  %v2910_v7 = vld [vmem:[%s3690_s6 + $0x70] ss:$8 sps:$4 sm:$0xff]  }
 0xd28   :  { %v2956_v8 = vpop.eup %2955 }
 0xd29   :  { %v1488_v11 = vmul.f32 %v2956_v8, %v2952_v56 }
 0xd2b   :  { %v1489_v12 = vpack.c.bf16 %v1488_v11, %v1488_v11 }
 0xd2d   :  { %2699 = vmatmul.mubr.msk.bf16.vlgmr.msra.gmra.mrb[28].mxu1 %vm411_vm4, %v1489_v12  ;;  %v1872_v12 = vrot.slane %v3416_v39, %v3149_v5  ;;  %v2914_v5 = vld [vmem:[%s3691_s7 + $0x80] sm:$0xff]  }
 0xd2e   :  { %2709 = vmatpush3.bf16.msra.mxu1 %v1615_v13  ;;  %2710 = vmatprep.mubr.msk.bf16.mxu1 %vm2969_vm1, %v2968_v47 }
 0xd2f   :  { %2734 = vmatprep.subr.bf16.mxu1 %v2968_v47 }
 0xd30   :  { %v2958_v31 = vpop.eup %2957 }
 0xd31   :  { %v1609_v41 = vmul.f32 %v2958_v31, %v2954_v58 }
 0xd33   :  { %v1610_v15 = vpack.c.bf16 %v1609_v41, %v1609_v41  ;;  %v1877_v41 = vrot.slane %v3416_v39, %v810_v59  ;;  %v2915_v59 = vld [vmem:[%s3691_s7 + $0xc8] sm:$0xff]  }
 0xd35   :  { %2711 = vmatmul.mubr.msk.bf16.vlgmr.msra.gmra.mrb[32].mxu1 %vm411_vm4, %v1610_v15 }
 0xd36   :  { %2735 = vmatpush3.bf16.msra.mxu1 %v2885_v14  ;;  %2750 = vmatprep.mubr.msk.bf16.mxu1 %vm2969_vm1, %v2968_v47 }
 0xd37   :  { %2736 = vmatprep.subr.bf16.mxu1 %v2968_v47 }
 0xd3a   :  { %2737 = vmatpush3.bf16.msra.mxu1 %v2886_v3 }
 0xd3b   :  { %2738 = vmatprep.subr.bf16.mxu1 %v2968_v47 }
 0xd3e   :  { %2739 = vmatpush3.bf16.msra.mxu1 %v2888_v16  ;;  %v2913_v16 = vld [vmem:[%s3691_s7 + $0xc0] sm:$0xff]  }
 0xd3f   :  { %2740 = vmatprep.subr.bf16.mxu1 %v2968_v47 }
 0xd42   :  { %2741 = vmatpush3.bf16.msra.mxu1 %v2890_v17  ;;  %v2916_v17 = vld [vmem:[%s3691_s7 + $0x88] sm:$0xff]  }
 0xd43   :  { %2742 = vmatprep.subr.bf16.mxu1 %v2968_v47 }
 0xd46   :  { %2743 = vmatpush3.bf16.msra.mxu1 %v2892_v18  ;;  %v2917_v18 = vld [vmem:[%s3691_s7 + $0xd0] sm:$0xff]  }
 0xd47   :  { %2744 = vmatprep.subr.bf16.mxu1 %v2968_v47 }
 0xd4a   :  { %2745 = vmatpush3.bf16.msra.mxu1 %v2894_v20  ;;  %v2918_v20 = vld [vmem:[%s3691_s7 + $0x90] sm:$0xff]  }
 0xd4b   :  { %2746 = vmatprep.subr.bf16.mxu1 %v2968_v47 }
 0xd4e   :  { %2747 = vmatpush3.bf16.msra.mxu1 %v2896_v21  ;;  %v2919_v21 = vld [vmem:[%s3691_s7 + $0xd8] sm:$0xff]  }
 0xd4f   :  { %2748 = vmatprep.subr.bf16.mxu1 %v2968_v47 }
 0xd52   :  { %2749 = vmatpush3.bf16.msra.mxu1 %v2898_v24  ;;  %v2921_v24 = vld [vmem:[%s3691_s7 + $0xe0] sm:$0xff]  }
 0xd53   :  { %2599 = vmatprep.subr.bf16.mxu1 %v2913_v16 }
 0xe00   :  { %v1530_v28 = vpop.f32.mrb[28].mxu1 }
 0xe01   :  { %v1536_v33 = vpack.c.bf16 %v1530_v28, %v1530_v28  ;;  %v2700_v35 = vpop.f32.mrb[29].mxu1  ;;  %v2924_v28 = vld [vmem:[%s3691_s7 + $0xa8] sm:$0xff]  }
 0xe02   :  { %v1533_v27 = vpop.f32.mrb[30].mxu1  ;;  %v2926_v35 = vld [vmem:[%s3691_s7 + $0xb0] sm:$0xff]  }
 0xe03   :  { %v2701_v36 = vpop.f32.mrb[31].mxu1  ;;  %2751 = vmatmul.mubr.bf16.vlgmr.msra.gmra.mrb[36].mxu1 %v1536_v33  ;;  %v2925_v33 = vld [vmem:[%s3691_s7 + $0xf0] sm:$0xff]   ;;  %v2927_v27 = vld [vmem:[%s3691_s7 + $0xf8] sm:$0xff]  }
 0xe04   :  { %2600 = vmatpush3.bf16.msra.mxu1 %v2914_v5  ;;  %v2928_v36 = vld [vmem:[%s3691_s7 + $0xb8] sm:$0xff]  }
 0xe05   :  { %2601 = vmatprep.subr.bf16.mxu1 %v2915_v59 }
 0xe08   :  { %v1651_v37 = vpop.f32.mrb[32].mxu1  ;;  %2602 = vmatpush3.bf16.msra.mxu1 %v2916_v17 }
 0xe09   :  { %v1657_v38 = vpack.c.bf16 %v1651_v37, %v1651_v37  ;;  %v2712_v40 = vpop.f32.mrb[33].mxu1  ;;  %2603 = vmatprep.subr.bf16.mxu1 %v2917_v18  ;;  %v2351_v37 = vld [vmem:[%s3688_s1 + $0x28] sm:$0xff] }
 0xe0a   :  { %v1654_v42 = vpop.f32.mrb[34].mxu1  ;;  %v1896_v40 = vrot.slane %v2351_v37, %v3341_v23 }
 0xe0b   :  { %v2713_v43 = vpop.f32.mrb[35].mxu1  ;;  %2731 = vmatmul.mubr.bf16.vlgmr.msra.gmra.mrb[36].mxu0 %v1657_v38  ;;  %v1892_v38 = vrot.slane %v3416_v39, %v3341_v23 }
 0xe0c   :  { %1972 = vmatprep.mubr.bf16.mxu0 %v2967_v9  ;;  %2604 = vmatpush3.bf16.msra.mxu1 %v2918_v20  ;;  %v2175_v20 = vld [vmem:[%s3693_s8] sm:$0x3] }
 0xe0d   :  { %2605 = vmatprep.subr.bf16.mxu1 %v2919_v21  ;;  %v2192_v21 = vrot.slane %v2175_v20, %v3091_v30 }
 0xe10   :  { %2606 = vmatpush3.bf16.msra.mxu1 %v2920_v22 }
 0xe11   :  { %2607 = vmatprep.subr.bf16.mxu1 %v2921_v24 }
 0xe14   :  { %2608 = vmatpush3.bf16.msra.mxu1 %v2922_v25  ;;  %v2197_v25 = vrot.slane %v2175_v20, %v3099_v32 }
 0xe15   :  { %2609 = vmatprep.subr.bf16.mxu1 %v2923_v26 }
 0xe18   :  { %2610 = vmatpush3.bf16.msra.mxu1 %v2924_v28 }
 0xe19   :  { %2611 = vmatprep.subr.bf16.mxu1 %v2925_v33 }
 0xe1c   :  { %2612 = vmatpush3.bf16.msra.mxu1 %v2926_v35 }
 0xe1d   :  { %2613 = vmatprep.subr.bf16.mxu1 %v2927_v27 }
 0xe20   :  { %2614 = vmatpush3.bf16.msra.mxu1 %v2928_v36 }
 0xed6   :  { %v1844_v44 = vpop.f32.mrb[36].mxu1 }
 0xed7   :  { %v2752_v45 = vpop.f32.mrb[37].mxu1 }
 0xed8   :  { %v1847_v46 = vpop.f32.mrb[38].mxu1 }
 0xed9   :  { %v2753_v48 = vpop.f32.mrb[39].mxu1 }
 0xede   :  { %v1756_v49 = vpop.f32.mrb[36].mxu0 }
 0xedf   :  { %v1845_v0 = vadd.f32 %v1844_v44, %v1756_v49  ;;  %v2732_v51 = vpop.f32.mrb[37].mxu0 }
 0xee0   :  { %v1759_v52 = vpop.f32.mrb[38].mxu0 }
 0xee1   :  { %v1850_v53 = vadd.f32 %v1845_v0, %v3355_v6  ;;  %v2733_v54 = vpop.f32.mrb[39].mxu0  ;;  %v2901_v6 = vld [vmem:[%s3690_s6 + $0x40] ss:$8 sps:$4 sm:$0xff]  }
 0xee2   :  { %1941 = vmatpush1.bf16.msra.mxu0 %v2901_v6 }
 0xee3   :  { %v3561_v55 = vadd.f32 %v1854_v50, %v1850_v53  ;;  %1942 = vmatprep.subr.bf16.mxu0 %v2906_v62 }
 0xee5   :  { %v1856_v9 = vsel %vm46_vm0, %v3561_v55, 0.0 }
 0xee6   :  { %1857 = vadd.xlane.f32.xlu0 %v1856_v9  ;;  %1943 = vmatpush1.bf16.msra.mxu0 %v2904_v63 }
 0xee7   :  { %1944 = vmatprep.subr.bf16.mxu0 %v2909_v1 }
 0xeea   :  { %1945 = vmatpush1.bf16.msra.mxu0 %v2907_v2 }
 0xeeb   :  { %1946 = vmatprep.subr.bf16.mxu0 %v2912_v4 }
 0xeee   :  { %1947 = vmatpush1.bf16.msra.mxu0 %v2910_v7  ;;  %v2037_v7 = vrot.slane %v3416_v39, %v968_v60  ;;  %v2930_v60 = vld [vmem:[%s3692_s9 + $0x8] sm:$0xff]   ;;  %v2931_v39 = vld [vmem:[%s3692_s9 + $0x10] sm:$0xff]  }
 0xeef   :  { %2754 = vmatprep.subr.bf16.mxu0 %v2968_v47 }
 0xf73   :  { %v1858_v56 = vpop.xlane.xlu0 %1857 }
 0xf74   :  { %v1859_v57 = vmul.f32 0.015625, %v1858_v56 }
 0xf76   :  { %v1860_v58 = vsub.f32 %v3561_v55, %v1859_v57 }
 0xf78   :  { %v1861_v61 = vmul.f32 %v1860_v58, %v1860_v58 }
 0xf7a   :  { %v1862_v19 = vsel %vm46_vm0, %v1861_v61, 0.0 }
 0xf7b   :  { %1863 = vadd.xlane.f32.xlu1 %v1862_v19 }
0x1008   :  { %v1864_v8 = vpop.xlane.xlu1 %1863 }
0x1009   :  { %v1865_v10 = vmul.f32 0.015625, %v1864_v8 }
0x100b   :  { %v1866_v11 = vadd.f32 1e-05, %v1865_v10 }
0x100d   :  { %2959 = vrsqrt.f32 %v1866_v11 }
0x1017   :  { %v2960_v13 = vpop.eup %2959 }
0x1018   :  { %v1868_v31 = vmul.f32 %v2960_v13, %v1860_v58 }
0x101a   :  { %v1873_v14 = vmul.f32 %v1872_v12, %v1868_v31 }
0x101c   :  { %v1878_v15 = vadd.f32 %v1877_v41, %v1873_v14 }
0x101e   :  { %v1879_v3 = vpack.c.bf16 %v1878_v15, %v1878_v15 }
0x1020   :  { %2471 = vmatmul.mubr.msk.bf16.vlgmr.msra.gmra.mrb[40].mxu0 %vm46_vm0, %v1879_v3 }
0x1021   :  { %2762 = vmatprep.mubr.msk.bf16.mxu0 %vm2969_vm1, %v2968_v47  ;;  %2755 = vmatpush3.bf16.msra.mxu0 %v2929_v29 }
0x1022   :  { %2756 = vmatprep.subr.bf16.mxu0 %v2968_v47 }
0x1025   :  { %2757 = vmatpush3.bf16.msra.mxu0 %v2930_v60 }
0x1026   :  { %2758 = vmatprep.subr.bf16.mxu0 %v2968_v47 }
0x1029   :  { %2759 = vmatpush3.bf16.msra.mxu0 %v2931_v39 }
0x102a   :  { %2760 = vmatprep.subr.bf16.mxu0 %v2968_v47 }
0x10f3   :  { %v1974_v42 = vpop.f32.mrb[40].mxu0 }
0x10f4   :  { %v1975_v43 = vadd.f32 %v1974_v42, %v1892_v38  ;;  %v1976_v44 = vpop.f32.mrb[41].mxu0 }
0x10f5   :  { %v1977_v45 = vadd.f32 %v1976_v44, %v1896_v40  ;;  %v1978_v46 = vpop.f32.mrb[42].mxu0 }
0x10f6   :  { %v1983_v48 = vmul.f32 0.044715, %v1975_v43  ;;  %v1979_v49 = vpop.f32.mrb[43].mxu0  ;;  %v1981_v61 = vmul.f32 0.5, %v1975_v43 }
0x10f7   :  { %v1984_v0 = vmul.f32 0.044715, %v1977_v45  ;;  %v1982_v34 = vmul.f32 0.5, %v1977_v45 }
0x10f8   :  { %v1985_v50 = vmul.f32 %v1983_v48, %v1975_v43 }
0x10f9   :  { %v1986_v51 = vmul.f32 %v1984_v0, %v1977_v45 }
0x10fa   :  { %v1987_v52 = vmul.f32 %v1985_v50, %v1975_v43 }
0x10fb   :  { %v1988_v53 = vmul.f32 %v1986_v51, %v1977_v45 }
0x10fc   :  { %v1989_v54 = vadd.f32 %v1987_v52, %v1975_v43 }
0x10fd   :  { %v1990_v9 = vadd.f32 %v1988_v53, %v1977_v45 }
0x10fe   :  { %v1991_v56 = vmul.f32 0.7978846, %v1989_v54 }
0x10ff   :  { %v1992_v57 = vmul.f32 0.7978846, %v1990_v9 }
0x1100   :  { %2961 = vtanh.f32 %v1991_v56 }
0x1101   :  { %2963 = vtanh.f32 %v1992_v57 }
0x110a   :  { %v2962_v58 = vpop.eup %2961 }
0x110b   :  { %v2964_v23 = vpop.eup %2963  ;;  %v1995_v19 = vadd.f32 1.0, %v2962_v58 }
0x110c   :  { %v1996_v6 = vadd.f32 1.0, %v2964_v23 }
0x110d   :  { %v1997_v62 = vmul.f32 %v1995_v19, %v1981_v61 }
0x110e   :  { %v1998_v63 = vmul.f32 %v1996_v6, %v1982_v34 }
0x110f   :  { %v1999_v2 = vpack.c.bf16 %v1997_v62, %v1997_v62 }
0x1110   :  { %v2000_v1 = vpack.c.bf16 %v1998_v63, %v1998_v63 }
0x1112   :  { %2166 = vmatprep.mubr.bf16.mxu1 %v2000_v1 }
0x1113   :  { %2167 = vmatmul.mubr.bf16.vlgmr.msra.gmra.mrb[40].mxu1 %v1999_v2 }
0x11e6   :  { %v2615_v4 = vpop.f32.mrb[40].mxu1 }
0x11e7   :  { %v2616_v8 = vpop.f32.mrb[41].mxu1 }
0x11e8   :  { %v2617_v10 = vadd.f32 %v2616_v8, %v2615_v4  ;;  %v2618_v11 = vpop.f32.mrb[42].mxu1 }
0x11e9   :  { %v2619_v12 = vpop.f32.mrb[43].mxu1 }
0x11ea   :  { %v2169_v13 = vadd.f32 %v2617_v10, %v2037_v7 }
0x11ec   :  { %v2174_v31 = vadd.f32 %v2169_v13, %v3561_v55  ;;  %v2932_v55 = vld [vmem:[%s3692_s9 + $0x18] sm:$0xff]  }
0x11ed   :  { %2761 = vmatpush3.bf16.msra.mxu0 %v2932_v55 }
0x11ee   :  { %v2176_v41 = vsel %vm46_vm0, %v2174_v31, 0.0 }
0x11ef   :  { %2177 = vadd.xlane.f32.xlu0 %v2176_v41 }
0x127c   :  { %v2178_v14 = vpop.xlane.xlu0 %2177 }
0x127d   :  { %v2179_v15 = vmul.f32 0.015625, %v2178_v14 }
0x127f   :  { %v2180_v3 = vsub.f32 %v2174_v31, %v2179_v15 }
0x1281   :  { %v2181_v16 = vmul.f32 %v2180_v3, %v2180_v3 }
0x1283   :  { %v2182_v5 = vsel %vm46_vm0, %v2181_v16, 0.0 }
0x1284   :  { %2183 = vadd.xlane.f32.xlu1 %v2182_v5 }
0x1311   :  { %v2184_v59 = vpop.xlane.xlu1 %2183 }
0x1312   :  { %v2185_v17 = vmul.f32 0.015625, %v2184_v59 }
0x1314   :  { %v2186_v18 = vadd.f32 1e-05, %v2185_v17 }
0x1316   :  { %2965 = vrsqrt.f32 %v2186_v18 }
0x1320   :  { %v2966_v22 = vpop.eup %2965 }
0x1321   :  { %v2188_v24 = vmul.f32 %v2966_v22, %v2180_v3 }
0x1323   :  { %v2193_v26 = vmul.f32 %v2192_v21, %v2188_v24 }
0x1325   :  { %v2198_v28 = vadd.f32 %v2197_v25, %v2193_v26 }
0x1327   :  { %v2199_v33 = vpack.c.bf16 %v2198_v28, %v2198_v28 }
0x1329   :  { %2763 = vmatmul.mubr.msk.bf16.vlgmr.msra.gmra.mrb[44].mxu0 %vm46_vm0, %v2199_v33 }
0x13fc   :  { %v2269_v47 = vpop.f32.mrb[44].mxu0 }
0x13fd   :  { %2275 = vst [vmem:[%s3694_s10] sm:$0xff] %v2269_v47  ;;  %v2764_v35 = vpop.f32.mrb[45].mxu0 }
0x13fe   :  { %v2272_v27 = vpop.f32.mrb[46].mxu0 }
0x13ff   :  { %v2765_v36 = vpop.f32.mrb[47].mxu0 }

</bundles_post_ra>
